<compile_context>
chip_gen: v7x
topology: tpu7x:2x2x1
jax: 0.10.0
libtpu: 0.0.40
codegen_flags: <defaults>
</compile_context>

<pallas_src>
import functools

import jax
import jax.numpy as jnp
from jax.experimental import pallas as pl
from jax.experimental.pallas import tpu as pltpu


# ------------------------------- helpers ----------------------------------- #

def _round_up(x, m):
    return ((x + m - 1) // m) * m


def _pad_to(a, shape):
    """Zero-pad array `a` up to `shape` (same rank)."""
    out = jnp.zeros(shape, a.dtype)
    return out.at[tuple(slice(0, s) for s in a.shape)].set(a)


# ------------------------------ fused kernel ------------------------------- #

def _make_decoder_kernel(num_layers, batch_pad, batch, h_pad):
    """Fused single-step decoder kernel (static layer count / padding)."""

    def kernel(*refs):
        it = 0
        ids_ref = refs[it]; it += 1            # SMEM (B_pad,)      int32
        emb_hbm = refs[it]; it += 1            # HBM  (V, E_pad)    f32
        layer_refs = []
        for _ in range(num_layers):            # per layer:
            layer_refs.append(refs[it:it + 4])  # Wih(D_pad,3H) bf16, Whh(H,3H) bf16,
            it += 4                             # bih(B_pad,3H) f32,  bhh(B_pad,3H) f32
        fc_w_ref = refs[it]; it += 1           # VMEM (H_pad, TILE_V)   bf16 tile
        fc_b_ref = refs[it]; it += 1           # VMEM (B_pad, TILE_V)   f32 tile
        h_in_ref = refs[it]; it += 1           # VMEM (L, B_pad, H_pad) f32
        logits_ref = refs[it]; it += 1         # out  (B_pad, TILE_V)   f32 tile
        h_out_ref = refs[it]; it += 1          # out  (L, B_pad, H_pad) f32 (aliased)
        x_emb = refs[it]; it += 1              # scratch (B_pad, E_pad) f32
        x_last = refs[it]; it += 1             # scratch (B_pad, H_pad) bf16
        gsem = refs[it]; it += 1               # DMA semaphores (B_pad,)

        # ---- GRU stack: run once, on the first vocab tile ----
        @pl.when(pl.program_id(0) == 0)
        def _gru_once():
            # Embedding gather: one small row DMA per (padded) batch element.
            copies = []
            for b in range(batch_pad):
                idx = ids_ref[b]
                cp = pltpu.make_async_copy(
                    emb_hbm.at[pl.ds(idx, 1), :],
                    x_emb.at[pl.ds(b, 1), :],
                    gsem.at[b])
                cp.start()
                copies.append(cp)
            for cp in copies:
                cp.wait()

            # Zero padded batch rows so the padded hidden state never drifts.
            row = jax.lax.broadcasted_iota(jnp.int32, (batch_pad, 1), 0)
            valid = (row < batch).astype(jnp.float32)

            x = x_emb[...].astype(jnp.bfloat16)            # (B_pad, E_pad)
            for l in range(num_layers):
                wih_ref, whh_ref, bih_ref, bhh_ref = layer_refs[l]
                h = h_in_ref[l]                             # (B_pad, H_pad) f32
                gi = jnp.dot(x, wih_ref[...],
                             preferred_element_type=jnp.float32) + bih_ref[...]
                gh = jnp.dot(h.astype(jnp.bfloat16), whh_ref[...],
                             preferred_element_type=jnp.float32) + bhh_ref[...]
                # r/z/n slices are 128-lane aligned (per-gate padding to H_pad).
                r = jax.nn.sigmoid(gi[:, :h_pad] + gh[:, :h_pad])
                z = jax.nn.sigmoid(gi[:, h_pad:2 * h_pad] + gh[:, h_pad:2 * h_pad])
                n = jnp.tanh(gi[:, 2 * h_pad:] + r * gh[:, 2 * h_pad:])
                h_new = (n + z * (h - n)) * valid
                h_out_ref[l] = h_new
                x = h_new.astype(jnp.bfloat16)
            x_last[...] = x

        # ---- final Linear: one vocab tile per grid step ----
        logits_ref[...] = (
            jnp.dot(x_last[...], fc_w_ref[...],
                    preferred_element_type=jnp.float32) + fc_b_ref[...])

    return kernel


# --------------------------- Decoder forward pass --------------------------- #

@functools.partial(jax.jit, static_argnames=("batch", "tile_v"))
def decoder_forward(padded, ids_pad, hidden_pad, *, batch, tile_v=128):
    """Equivalent of Decoder.forward(x, hidden) at inference.

    ids_pad:    (B_pad,) int32 token ids (padded rows may hold any valid id)
    hidden_pad: (num_layers, B_pad, H_pad) float32 padded hidden state
    returns:    padded logits (B_pad, V_pad) and updated padded hidden state.
    """
    num_layers, batch_pad, h_pad = hidden_pad.shape
    e_pad = padded["embedding"].shape[1]
    v_pad = padded["fc_w"].shape[1]
    tile_v = min(tile_v, v_pad)
    assert v_pad % tile_v == 0
    n_tiles = v_pad // tile_v

    args = [ids_pad, padded["embedding"]]
    for layer_weights in padded["layers"]:
        args.extend(layer_weights)
    args.extend([padded["fc_w"], padded["fc_b"], hidden_pad])

    vmem = pl.BlockSpec(memory_space=pltpu.MemorySpace.VMEM)
    smem = pl.BlockSpec(memory_space=pltpu.MemorySpace.SMEM)
    hbm = pl.BlockSpec(memory_space=pl.ANY)

    in_specs = ([smem, hbm]
                + [vmem] * (4 * num_layers)
                + [pl.BlockSpec((h_pad, tile_v), lambda j: (0, j)),       # fc_w tile
                   pl.BlockSpec((batch_pad, tile_v), lambda j: (0, j)),   # fc_b tile
                   vmem])                                                 # hidden in
    out_specs = (pl.BlockSpec((batch_pad, tile_v), lambda j: (0, j)),     # logits
                 vmem)                                                    # hidden out

    grid_spec = pltpu.PrefetchScalarGridSpec(
        num_scalar_prefetch=0,
        grid=(n_tiles,),
        in_specs=in_specs,
        out_specs=out_specs,
        scratch_shapes=[
            pltpu.VMEM((batch_pad, e_pad), jnp.float32),    # gathered embeddings
            pltpu.VMEM((batch_pad, h_pad), jnp.bfloat16),   # last layer output
            pltpu.SemaphoreType.DMA((batch_pad,)),
        ])

    logits_pad, hidden_out_pad = pl.pallas_call(
        _make_decoder_kernel(num_layers, batch_pad, batch, h_pad),
        grid_spec=grid_spec,
        out_shape=(jax.ShapeDtypeStruct((batch_pad, v_pad), jnp.float32),
                   jax.ShapeDtypeStruct(hidden_pad.shape, jnp.float32)),
        input_output_aliases={len(args) - 1: 1},      # hidden updated in place
        compiler_params=pltpu.CompilerParams(
            dimension_semantics=("arbitrary",),        # GRU at step 0 feeds all tiles
            vmem_limit_bytes=48 * 1024 * 1024),
    )(*args)

    return logits_pad, hidden_out_pad


# ------------------------- Pure-JAX reference check ------------------------ #

def decoder_forward_ref(raw, x_tokens, hidden):
    """PyTorch GRU semantics with the same bf16 weight/activation quantization."""
    bf = lambda a: a.astype(jnp.bfloat16)
    x = raw["embedding"][x_tokens]
    new_hidden = []
    for (w_ih, w_hh, b_ih, b_hh) in raw["gru"]:
        h = hidden[len(new_hidden)]
        H = h.shape[-1]
        gi = jnp.dot(bf(x), bf(w_ih).T, preferred_element_type=jnp.float32) + b_ih
        gh = jnp.dot(bf(h), bf(w_hh).T, preferred_element_type=jnp.float32) + b_hh
        r = jax.nn.sigmoid(gi[:, :H] + gh[:, :H])
        z = jax.nn.sigmoid(gi[:, H:2 * H] + gh[:, H:2 * H])
        n = jnp.tanh(gi[:, 2 * H:] + r * gh[:, 2 * H:])
        h_new = n + z * (h - n)
        new_hidden.append(h_new)
        x = h_new
    preds = (jnp.dot(bf(x), bf(raw["fc_w"]).T,
                     preferred_element_type=jnp.float32) + raw["fc_b"])
    return preds, jnp.stack(new_hidden, axis=0)


# ------------------------------ Parameter init ----------------------------- #

def init_raw_params(key, output_size, embedding_size, hidden_size, num_layers):
    """PyTorch-layout parameters (weight_ih (3H, D), weight_hh (3H, H), ...)."""
    k = hidden_size ** -0.5
    keys = jax.random.split(key, 1 + 4 * num_layers + 2)
    it = iter(keys)

    embedding = jax.random.normal(next(it), (output_size, embedding_size),
                                  jnp.float32)
    gru = []
    for l in range(num_layers):
        in_dim = embedding_size if l == 0 else hidden_size
        w_ih = jax.random.uniform(next(it), (3 * hidden_size, in_dim),
                                  jnp.float32, -k, k)
        w_hh = jax.random.uniform(next(it), (3 * hidden_size, hidden_size),
                                  jnp.float32, -k, k)
        b_ih = jax.random.uniform(next(it), (3 * hidden_size,),
                                  jnp.float32, -k, k)
        b_hh = jax.random.uniform(next(it), (3 * hidden_size,),
                                  jnp.float32, -k, k)
        gru.append((w_ih, w_hh, b_ih, b_hh))

    fc_w = jax.random.uniform(next(it), (output_size, hidden_size),
                              jnp.float32, -k, k)
    fc_b = jax.random.uniform(next(it), (output_size,), jnp.float32, -k, k)
    return {"embedding": embedding, "gru": gru, "fc_w": fc_w, "fc_b": fc_b}


def build_padded_params(raw, batch_pad):
    """Re-layout raw params into vreg-aligned, stacked-gate bf16 kernel params."""
    V, E = raw["embedding"].shape
    H = raw["gru"][0][1].shape[1]              # w_hh: (3H, H)
    E_pad = _round_up(E, 128)
    H_pad = _round_up(H, 128)
    V_pad = _round_up(V, 128)

    # Embedding stays in HBM; only lane-pad rows (gathered rows are tiny).
    emb_pad = _pad_to(raw["embedding"], (V, E_pad))

    layers = []
    for (w_ih, w_hh, b_ih, b_hh) in raw["gru"]:
        in_dim = w_ih.shape[1]
        D_pad = _round_up(in_dim, 128)

        wih_g = jnp.split(w_ih, 3, axis=0)     # r, z, n each (H, in_dim)
        whh_g = jnp.split(w_hh, 3, axis=0)     # r, z, n each (H, H)
        bih_g = jnp.split(b_ih, 3)
        bhh_g = jnp.split(b_hh, 3)

        # Stacked per-gate transposed weights: one gi dot + one gh dot per layer.
        wih_all = jnp.concatenate(
            [_pad_to(w.T, (D_pad, H_pad)) for w in wih_g], axis=1).astype(jnp.bfloat16)
        whh_all = jnp.concatenate(
            [_pad_to(w.T, (H_pad, H_pad)) for w in whh_g], axis=1).astype(jnp.bfloat16)
        # Biases pre-broadcast to (B_pad, 3H_pad); kept separate so that
        # n = tanh(gi_n + b_ih_n + r * (gh_n + b_hh_n)) matches PyTorch exactly.
        bih_all = jnp.broadcast_to(jnp.concatenate(
            [_pad_to(b[None, :], (1, H_pad)) for b in bih_g], axis=1),
            (batch_pad, 3 * H_pad))
        bhh_all = jnp.broadcast_to(jnp.concatenate(
            [_pad_to(b[None, :], (1, H_pad)) for b in bhh_g], axis=1),
            (batch_pad, 3 * H_pad))

        layers.append((wih_all, whh_all, bih_all, bhh_all))

    fc_w = _pad_to(raw["fc_w"].T, (H_pad, V_pad)).astype(jnp.bfloat16)
    fc_b = jnp.broadcast_to(_pad_to(raw["fc_b"][None, :], (1, V_pad)),
                            (batch_pad, V_pad))

    return {"embedding": emb_pad, "layers": layers, "fc_w": fc_w, "fc_b": fc_b}


# ----------------------------------- Main ----------------------------------- #

if __name__ == "__main__":
    # Small sizes consistent with the PyTorch module's forward.
    output_size = 200      # vocab size (V_pad = 256 -> exercises the fc tiling)
    embedding_size = 16
    hidden_size = 32
    num_layers = 2
    batch = 4

    key = jax.random.PRNGKey(0)
    pkey, xkey, hkey = jax.random.split(key, 3)

    raw_params = init_raw_params(pkey, output_size, embedding_size,
                                 hidden_size, num_layers)
    batch_pad = _round_up(batch, 8)
    padded_params = build_padded_params(raw_params, batch_pad)
    H_pad = padded_params["layers"][0][1].shape[0]

    x_tokens = jax.random.randint(xkey, (batch,), 0, output_size, dtype=jnp.int32)
    hidden = jax.random.normal(hkey, (num_layers, batch, hidden_size), jnp.float32)

    # Pad once; in a real decode loop ids/hidden stay padded across steps.
    ids_pad = jnp.zeros((batch_pad,), jnp.int32).at[:batch].set(x_tokens)
    hidden_pad = jnp.zeros((num_layers, batch_pad, H_pad),
                           jnp.float32).at[:, :batch, :hidden_size].set(hidden)

    logits_pad, hidden_out_pad = decoder_forward(padded_params, ids_pad,
                                                 hidden_pad, batch=batch)
    logits_pad = jax.block_until_ready(logits_pad)
    hidden_out_pad = jax.block_until_ready(hidden_out_pad)

    preds = logits_pad[:batch, :output_size]
    hidden_out = hidden_out_pad[:, :batch, :hidden_size]

    # Check against a pure-JAX reference with PyTorch GRU semantics (same bf16
    # weight quantization as the kernel, f32 accumulation).
    preds_ref, hidden_ref = decoder_forward_ref(raw_params, x_tokens, hidden)
    assert preds.shape == (batch, output_size)
    assert hidden_out.shape == (num_layers, batch, hidden_size)
    assert jnp.allclose(preds, preds_ref, atol=2e-3, rtol=2e-3), (
        float(jnp.max(jnp.abs(preds - preds_ref))))
    assert jnp.allclose(hidden_out, hidden_ref, atol=2e-3, rtol=2e-3), (
        float(jnp.max(jnp.abs(hidden_out - hidden_ref))))

    # Padded rows / lanes of the persistent hidden state must stay (near) zero.
    assert float(jnp.max(jnp.abs(hidden_out_pad[:, batch:, :]))) <= 1e-6
    assert float(jnp.max(jnp.abs(hidden_out_pad[:, :, hidden_size:]))) <= 1e-6

    print("KERNEL_OK")
</pallas_src>

<mosaic_0001>
module attributes {stable_mosaic.version = 11 : i64} {
  func.func @kernel(%arg0: i32, %arg1: memref<8xi32, #tpu.memory_space<smem>>, %arg2: memref<200x128xf32, #tpu.memory_space<any>>, %arg3: memref<128x384xbf16, #tpu.memory_space<vmem>>, %arg4: memref<128x384xbf16, #tpu.memory_space<vmem>>, %arg5: memref<8x384xf32, #tpu.memory_space<vmem>>, %arg6: memref<8x384xf32, #tpu.memory_space<vmem>>, %arg7: memref<128x384xbf16, #tpu.memory_space<vmem>>, %arg8: memref<128x384xbf16, #tpu.memory_space<vmem>>, %arg9: memref<8x384xf32, #tpu.memory_space<vmem>>, %arg10: memref<8x384xf32, #tpu.memory_space<vmem>>, %arg11: memref<128x128xbf16, #tpu.memory_space<vmem>>, %arg12: memref<8x128xf32, #tpu.memory_space<vmem>>, %arg13: memref<2x8x128xf32, #tpu.memory_space<vmem>>, %arg14: memref<8x128xf32, #tpu.memory_space<vmem>>, %arg15: memref<2x8x128xf32, #tpu.memory_space<vmem>>, %arg16: memref<8x128xf32, #tpu.memory_space<vmem>>, %arg17: memref<8x128xbf16, #tpu.memory_space<vmem>>, %arg18: memref<8x!tpu.dma_semaphore, #tpu.memory_space<semaphore_mem>>) attributes {dimension_semantics = [#tpu.dimension_semantics<arbitrary>], iteration_bounds = array<i64: 2>, scalar_prefetch = 0 : i64, scratch_operands = 3 : i64, tpu.core_type = #tpu.core_type<tc>, window_params = [{transform_indices = @transform_0, window_bounds = array<i64: 8>}, {}, {pipeline_mode = #tpu.pipeline_mode<synchronous>, transform_indices = @transform_2, window_bounds = array<i64: 128, 384>}, {pipeline_mode = #tpu.pipeline_mode<synchronous>, transform_indices = @transform_3, window_bounds = array<i64: 128, 384>}, {pipeline_mode = #tpu.pipeline_mode<synchronous>, transform_indices = @transform_4, window_bounds = array<i64: 8, 384>}, {pipeline_mode = #tpu.pipeline_mode<synchronous>, transform_indices = @transform_5, window_bounds = array<i64: 8, 384>}, {pipeline_mode = #tpu.pipeline_mode<synchronous>, transform_indices = @transform_6, window_bounds = array<i64: 128, 384>}, {pipeline_mode = #tpu.pipeline_mode<synchronous>, transform_indices = @transform_7, window_bounds = array<i64: 128, 384>}, {pipeline_mode = #tpu.pipeline_mode<synchronous>, transform_indices = @transform_8, window_bounds = array<i64: 8, 384>}, {pipeline_mode = #tpu.pipeline_mode<synchronous>, transform_indices = @transform_9, window_bounds = array<i64: 8, 384>}, {transform_indices = @transform_10, window_bounds = array<i64: 128, 128>}, {transform_indices = @transform_11, window_bounds = array<i64: 8, 128>}, {pipeline_mode = #tpu.pipeline_mode<synchronous>, transform_indices = @transform_12, window_bounds = array<i64: 2, 8, 128>}, {transform_indices = @transform_13, window_bounds = array<i64: 8, 128>}, {pipeline_mode = #tpu.pipeline_mode<synchronous>, transform_indices = @transform_14, window_bounds = array<i64: 2, 8, 128>}]} {
    %c0_i32 = arith.constant 0 : i32
    %0 = arith.cmpi eq, %arg0, %c0_i32 : i32
    %1 = arith.extui %0 : i1 to i32
    %c0_i32_0 = arith.constant 0 : i32
    %2 = arith.cmpi ne, %1, %c0_i32_0 : i32
    scf.if %2 {
      %c0_8 = arith.constant 0 : index
      %9 = memref.load %arg1[%c0_8] : memref<8xi32, #tpu.memory_space<smem>>
      %c0_i32_9 = arith.constant 0 : i32
      %c0_i32_10 = arith.constant 0 : i32
      %10 = tpu.memref_slice %arg2[%9, %c0_i32_10] : memref<200x128xf32, #tpu.memory_space<any>> -> memref<1x128xf32, #tpu.memory_space<any>>
      %c0_i32_11 = arith.constant 0 : i32
      %c0_i32_12 = arith.constant 0 : i32
      %11 = tpu.memref_slice %arg16[%c0_i32_11, %c0_i32_12] : memref<8x128xf32, #tpu.memory_space<vmem>> -> memref<1x128xf32, #tpu.memory_space<vmem>>
      %12 = tpu.memref_slice %arg18[%c0_i32_9] : memref<8x!tpu.dma_semaphore, #tpu.memory_space<semaphore_mem>> -> memref<1x!tpu.dma_semaphore, #tpu.memory_space<semaphore_mem>>
      %13 = tpu.memref_squeeze %12 : memref<1x!tpu.dma_semaphore, #tpu.memory_space<semaphore_mem>> -> memref<!tpu.dma_semaphore, #tpu.memory_space<semaphore_mem>>
      tpu.enqueue_dma source(%10 : memref<1x128xf32, #tpu.memory_space<any>>) target(%11 : memref<1x128xf32, #tpu.memory_space<vmem>>) target_semaphore(%13 : memref<!tpu.dma_semaphore, #tpu.memory_space<semaphore_mem>>)
      %c1 = arith.constant 1 : index
      %14 = memref.load %arg1[%c1] : memref<8xi32, #tpu.memory_space<smem>>
      %c1_i32 = arith.constant 1 : i32
      %c0_i32_13 = arith.constant 0 : i32
      %15 = tpu.memref_slice %arg2[%14, %c0_i32_13] : memref<200x128xf32, #tpu.memory_space<any>> -> memref<1x128xf32, #tpu.memory_space<any>>
      %c1_i32_14 = arith.constant 1 : i32
      %c0_i32_15 = arith.constant 0 : i32
      %16 = tpu.memref_slice %arg16[%c1_i32_14, %c0_i32_15] : memref<8x128xf32, #tpu.memory_space<vmem>> -> memref<1x128xf32, #tpu.memory_space<vmem>>
      %17 = tpu.memref_slice %arg18[%c1_i32] : memref<8x!tpu.dma_semaphore, #tpu.memory_space<semaphore_mem>> -> memref<1x!tpu.dma_semaphore, #tpu.memory_space<semaphore_mem>>
      %18 = tpu.memref_squeeze %17 : memref<1x!tpu.dma_semaphore, #tpu.memory_space<semaphore_mem>> -> memref<!tpu.dma_semaphore, #tpu.memory_space<semaphore_mem>>
      tpu.enqueue_dma source(%15 : memref<1x128xf32, #tpu.memory_space<any>>) target(%16 : memref<1x128xf32, #tpu.memory_space<vmem>>) target_semaphore(%18 : memref<!tpu.dma_semaphore, #tpu.memory_space<semaphore_mem>>)
      %c2 = arith.constant 2 : index
      %19 = memref.load %arg1[%c2] : memref<8xi32, #tpu.memory_space<smem>>
      %c2_i32 = arith.constant 2 : i32
      %c0_i32_16 = arith.constant 0 : i32
      %20 = tpu.memref_slice %arg2[%19, %c0_i32_16] : memref<200x128xf32, #tpu.memory_space<any>> -> memref<1x128xf32, #tpu.memory_space<any>>
      %c2_i32_17 = arith.constant 2 : i32
      %c0_i32_18 = arith.constant 0 : i32
      %21 = tpu.memref_slice %arg16[%c2_i32_17, %c0_i32_18] : memref<8x128xf32, #tpu.memory_space<vmem>> -> memref<1x128xf32, #tpu.memory_space<vmem>>
      %22 = tpu.memref_slice %arg18[%c2_i32] : memref<8x!tpu.dma_semaphore, #tpu.memory_space<semaphore_mem>> -> memref<1x!tpu.dma_semaphore, #tpu.memory_space<semaphore_mem>>
      %23 = tpu.memref_squeeze %22 : memref<1x!tpu.dma_semaphore, #tpu.memory_space<semaphore_mem>> -> memref<!tpu.dma_semaphore, #tpu.memory_space<semaphore_mem>>
      tpu.enqueue_dma source(%20 : memref<1x128xf32, #tpu.memory_space<any>>) target(%21 : memref<1x128xf32, #tpu.memory_space<vmem>>) target_semaphore(%23 : memref<!tpu.dma_semaphore, #tpu.memory_space<semaphore_mem>>)
      %c3 = arith.constant 3 : index
      %24 = memref.load %arg1[%c3] : memref<8xi32, #tpu.memory_space<smem>>
      %c3_i32 = arith.constant 3 : i32
      %c0_i32_19 = arith.constant 0 : i32
      %25 = tpu.memref_slice %arg2[%24, %c0_i32_19] : memref<200x128xf32, #tpu.memory_space<any>> -> memref<1x128xf32, #tpu.memory_space<any>>
      %c3_i32_20 = arith.constant 3 : i32
      %c0_i32_21 = arith.constant 0 : i32
      %26 = tpu.memref_slice %arg16[%c3_i32_20, %c0_i32_21] : memref<8x128xf32, #tpu.memory_space<vmem>> -> memref<1x128xf32, #tpu.memory_space<vmem>>
      %27 = tpu.memref_slice %arg18[%c3_i32] : memref<8x!tpu.dma_semaphore, #tpu.memory_space<semaphore_mem>> -> memref<1x!tpu.dma_semaphore, #tpu.memory_space<semaphore_mem>>
      %28 = tpu.memref_squeeze %27 : memref<1x!tpu.dma_semaphore, #tpu.memory_space<semaphore_mem>> -> memref<!tpu.dma_semaphore, #tpu.memory_space<semaphore_mem>>
      tpu.enqueue_dma source(%25 : memref<1x128xf32, #tpu.memory_space<any>>) target(%26 : memref<1x128xf32, #tpu.memory_space<vmem>>) target_semaphore(%28 : memref<!tpu.dma_semaphore, #tpu.memory_space<semaphore_mem>>)
      %c4 = arith.constant 4 : index
      %29 = memref.load %arg1[%c4] : memref<8xi32, #tpu.memory_space<smem>>
      %c4_i32 = arith.constant 4 : i32
      %c0_i32_22 = arith.constant 0 : i32
      %30 = tpu.memref_slice %arg2[%29, %c0_i32_22] : memref<200x128xf32, #tpu.memory_space<any>> -> memref<1x128xf32, #tpu.memory_space<any>>
      %c4_i32_23 = arith.constant 4 : i32
      %c0_i32_24 = arith.constant 0 : i32
      %31 = tpu.memref_slice %arg16[%c4_i32_23, %c0_i32_24] : memref<8x128xf32, #tpu.memory_space<vmem>> -> memref<1x128xf32, #tpu.memory_space<vmem>>
      %32 = tpu.memref_slice %arg18[%c4_i32] : memref<8x!tpu.dma_semaphore, #tpu.memory_space<semaphore_mem>> -> memref<1x!tpu.dma_semaphore, #tpu.memory_space<semaphore_mem>>
      %33 = tpu.memref_squeeze %32 : memref<1x!tpu.dma_semaphore, #tpu.memory_space<semaphore_mem>> -> memref<!tpu.dma_semaphore, #tpu.memory_space<semaphore_mem>>
      tpu.enqueue_dma source(%30 : memref<1x128xf32, #tpu.memory_space<any>>) target(%31 : memref<1x128xf32, #tpu.memory_space<vmem>>) target_semaphore(%33 : memref<!tpu.dma_semaphore, #tpu.memory_space<semaphore_mem>>)
      %c5 = arith.constant 5 : index
      %34 = memref.load %arg1[%c5] : memref<8xi32, #tpu.memory_space<smem>>
      %c5_i32 = arith.constant 5 : i32
      %c0_i32_25 = arith.constant 0 : i32
      %35 = tpu.memref_slice %arg2[%34, %c0_i32_25] : memref<200x128xf32, #tpu.memory_space<any>> -> memref<1x128xf32, #tpu.memory_space<any>>
      %c5_i32_26 = arith.constant 5 : i32
      %c0_i32_27 = arith.constant 0 : i32
      %36 = tpu.memref_slice %arg16[%c5_i32_26, %c0_i32_27] : memref<8x128xf32, #tpu.memory_space<vmem>> -> memref<1x128xf32, #tpu.memory_space<vmem>>
      %37 = tpu.memref_slice %arg18[%c5_i32] : memref<8x!tpu.dma_semaphore, #tpu.memory_space<semaphore_mem>> -> memref<1x!tpu.dma_semaphore, #tpu.memory_space<semaphore_mem>>
      %38 = tpu.memref_squeeze %37 : memref<1x!tpu.dma_semaphore, #tpu.memory_space<semaphore_mem>> -> memref<!tpu.dma_semaphore, #tpu.memory_space<semaphore_mem>>
      tpu.enqueue_dma source(%35 : memref<1x128xf32, #tpu.memory_space<any>>) target(%36 : memref<1x128xf32, #tpu.memory_space<vmem>>) target_semaphore(%38 : memref<!tpu.dma_semaphore, #tpu.memory_space<semaphore_mem>>)
      %c6 = arith.constant 6 : index
      %39 = memref.load %arg1[%c6] : memref<8xi32, #tpu.memory_space<smem>>
      %c6_i32 = arith.constant 6 : i32
      %c0_i32_28 = arith.constant 0 : i32
      %40 = tpu.memref_slice %arg2[%39, %c0_i32_28] : memref<200x128xf32, #tpu.memory_space<any>> -> memref<1x128xf32, #tpu.memory_space<any>>
      %c6_i32_29 = arith.constant 6 : i32
      %c0_i32_30 = arith.constant 0 : i32
      %41 = tpu.memref_slice %arg16[%c6_i32_29, %c0_i32_30] : memref<8x128xf32, #tpu.memory_space<vmem>> -> memref<1x128xf32, #tpu.memory_space<vmem>>
      %42 = tpu.memref_slice %arg18[%c6_i32] : memref<8x!tpu.dma_semaphore, #tpu.memory_space<semaphore_mem>> -> memref<1x!tpu.dma_semaphore, #tpu.memory_space<semaphore_mem>>
      %43 = tpu.memref_squeeze %42 : memref<1x!tpu.dma_semaphore, #tpu.memory_space<semaphore_mem>> -> memref<!tpu.dma_semaphore, #tpu.memory_space<semaphore_mem>>
      tpu.enqueue_dma source(%40 : memref<1x128xf32, #tpu.memory_space<any>>) target(%41 : memref<1x128xf32, #tpu.memory_space<vmem>>) target_semaphore(%43 : memref<!tpu.dma_semaphore, #tpu.memory_space<semaphore_mem>>)
      %c7 = arith.constant 7 : index
      %44 = memref.load %arg1[%c7] : memref<8xi32, #tpu.memory_space<smem>>
      %c7_i32 = arith.constant 7 : i32
      %c0_i32_31 = arith.constant 0 : i32
      %45 = tpu.memref_slice %arg2[%44, %c0_i32_31] : memref<200x128xf32, #tpu.memory_space<any>> -> memref<1x128xf32, #tpu.memory_space<any>>
      %c7_i32_32 = arith.constant 7 : i32
      %c0_i32_33 = arith.constant 0 : i32
      %46 = tpu.memref_slice %arg16[%c7_i32_32, %c0_i32_33] : memref<8x128xf32, #tpu.memory_space<vmem>> -> memref<1x128xf32, #tpu.memory_space<vmem>>
      %47 = tpu.memref_slice %arg18[%c7_i32] : memref<8x!tpu.dma_semaphore, #tpu.memory_space<semaphore_mem>> -> memref<1x!tpu.dma_semaphore, #tpu.memory_space<semaphore_mem>>
      %48 = tpu.memref_squeeze %47 : memref<1x!tpu.dma_semaphore, #tpu.memory_space<semaphore_mem>> -> memref<!tpu.dma_semaphore, #tpu.memory_space<semaphore_mem>>
      tpu.enqueue_dma source(%45 : memref<1x128xf32, #tpu.memory_space<any>>) target(%46 : memref<1x128xf32, #tpu.memory_space<vmem>>) target_semaphore(%48 : memref<!tpu.dma_semaphore, #tpu.memory_space<semaphore_mem>>)
      %c0_i32_34 = arith.constant 0 : i32
      %c0_i32_35 = arith.constant 0 : i32
      %49 = tpu.memref_slice %arg2[%9, %c0_i32_35] : memref<200x128xf32, #tpu.memory_space<any>> -> memref<1x128xf32, #tpu.memory_space<any>>
      %c0_i32_36 = arith.constant 0 : i32
      %c0_i32_37 = arith.constant 0 : i32
      %50 = tpu.memref_slice %arg16[%c0_i32_36, %c0_i32_37] : memref<8x128xf32, #tpu.memory_space<vmem>> -> memref<1x128xf32, #tpu.memory_space<vmem>>
      %51 = tpu.memref_slice %arg18[%c0_i32_34] : memref<8x!tpu.dma_semaphore, #tpu.memory_space<semaphore_mem>> -> memref<1x!tpu.dma_semaphore, #tpu.memory_space<semaphore_mem>>
      %52 = tpu.memref_squeeze %51 : memref<1x!tpu.dma_semaphore, #tpu.memory_space<semaphore_mem>> -> memref<!tpu.dma_semaphore, #tpu.memory_space<semaphore_mem>>
      tpu.wait_dma2 semaphore(%52 : memref<!tpu.dma_semaphore, #tpu.memory_space<semaphore_mem>>) src(%49 : memref<1x128xf32, #tpu.memory_space<any>>) dst(%50 : memref<1x128xf32, #tpu.memory_space<vmem>>)
      %c1_i32_38 = arith.constant 1 : i32
      %c0_i32_39 = arith.constant 0 : i32
      %53 = tpu.memref_slice %arg2[%14, %c0_i32_39] : memref<200x128xf32, #tpu.memory_space<any>> -> memref<1x128xf32, #tpu.memory_space<any>>
      %c1_i32_40 = arith.constant 1 : i32
      %c0_i32_41 = arith.constant 0 : i32
      %54 = tpu.memref_slice %arg16[%c1_i32_40, %c0_i32_41] : memref<8x128xf32, #tpu.memory_space<vmem>> -> memref<1x128xf32, #tpu.memory_space<vmem>>
      %55 = tpu.memref_slice %arg18[%c1_i32_38] : memref<8x!tpu.dma_semaphore, #tpu.memory_space<semaphore_mem>> -> memref<1x!tpu.dma_semaphore, #tpu.memory_space<semaphore_mem>>
      %56 = tpu.memref_squeeze %55 : memref<1x!tpu.dma_semaphore, #tpu.memory_space<semaphore_mem>> -> memref<!tpu.dma_semaphore, #tpu.memory_space<semaphore_mem>>
      tpu.wait_dma2 semaphore(%56 : memref<!tpu.dma_semaphore, #tpu.memory_space<semaphore_mem>>) src(%53 : memref<1x128xf32, #tpu.memory_space<any>>) dst(%54 : memref<1x128xf32, #tpu.memory_space<vmem>>)
      %c2_i32_42 = arith.constant 2 : i32
      %c0_i32_43 = arith.constant 0 : i32
      %57 = tpu.memref_slice %arg2[%19, %c0_i32_43] : memref<200x128xf32, #tpu.memory_space<any>> -> memref<1x128xf32, #tpu.memory_space<any>>
      %c2_i32_44 = arith.constant 2 : i32
      %c0_i32_45 = arith.constant 0 : i32
      %58 = tpu.memref_slice %arg16[%c2_i32_44, %c0_i32_45] : memref<8x128xf32, #tpu.memory_space<vmem>> -> memref<1x128xf32, #tpu.memory_space<vmem>>
      %59 = tpu.memref_slice %arg18[%c2_i32_42] : memref<8x!tpu.dma_semaphore, #tpu.memory_space<semaphore_mem>> -> memref<1x!tpu.dma_semaphore, #tpu.memory_space<semaphore_mem>>
      %60 = tpu.memref_squeeze %59 : memref<1x!tpu.dma_semaphore, #tpu.memory_space<semaphore_mem>> -> memref<!tpu.dma_semaphore, #tpu.memory_space<semaphore_mem>>
      tpu.wait_dma2 semaphore(%60 : memref<!tpu.dma_semaphore, #tpu.memory_space<semaphore_mem>>) src(%57 : memref<1x128xf32, #tpu.memory_space<any>>) dst(%58 : memref<1x128xf32, #tpu.memory_space<vmem>>)
      %c3_i32_46 = arith.constant 3 : i32
      %c0_i32_47 = arith.constant 0 : i32
      %61 = tpu.memref_slice %arg2[%24, %c0_i32_47] : memref<200x128xf32, #tpu.memory_space<any>> -> memref<1x128xf32, #tpu.memory_space<any>>
      %c3_i32_48 = arith.constant 3 : i32
      %c0_i32_49 = arith.constant 0 : i32
      %62 = tpu.memref_slice %arg16[%c3_i32_48, %c0_i32_49] : memref<8x128xf32, #tpu.memory_space<vmem>> -> memref<1x128xf32, #tpu.memory_space<vmem>>
      %63 = tpu.memref_slice %arg18[%c3_i32_46] : memref<8x!tpu.dma_semaphore, #tpu.memory_space<semaphore_mem>> -> memref<1x!tpu.dma_semaphore, #tpu.memory_space<semaphore_mem>>
      %64 = tpu.memref_squeeze %63 : memref<1x!tpu.dma_semaphore, #tpu.memory_space<semaphore_mem>> -> memref<!tpu.dma_semaphore, #tpu.memory_space<semaphore_mem>>
      tpu.wait_dma2 semaphore(%64 : memref<!tpu.dma_semaphore, #tpu.memory_space<semaphore_mem>>) src(%61 : memref<1x128xf32, #tpu.memory_space<any>>) dst(%62 : memref<1x128xf32, #tpu.memory_space<vmem>>)
      %c4_i32_50 = arith.constant 4 : i32
      %c0_i32_51 = arith.constant 0 : i32
      %65 = tpu.memref_slice %arg2[%29, %c0_i32_51] : memref<200x128xf32, #tpu.memory_space<any>> -> memref<1x128xf32, #tpu.memory_space<any>>
      %c4_i32_52 = arith.constant 4 : i32
      %c0_i32_53 = arith.constant 0 : i32
      %66 = tpu.memref_slice %arg16[%c4_i32_52, %c0_i32_53] : memref<8x128xf32, #tpu.memory_space<vmem>> -> memref<1x128xf32, #tpu.memory_space<vmem>>
      %67 = tpu.memref_slice %arg18[%c4_i32_50] : memref<8x!tpu.dma_semaphore, #tpu.memory_space<semaphore_mem>> -> memref<1x!tpu.dma_semaphore, #tpu.memory_space<semaphore_mem>>
      %68 = tpu.memref_squeeze %67 : memref<1x!tpu.dma_semaphore, #tpu.memory_space<semaphore_mem>> -> memref<!tpu.dma_semaphore, #tpu.memory_space<semaphore_mem>>
      tpu.wait_dma2 semaphore(%68 : memref<!tpu.dma_semaphore, #tpu.memory_space<semaphore_mem>>) src(%65 : memref<1x128xf32, #tpu.memory_space<any>>) dst(%66 : memref<1x128xf32, #tpu.memory_space<vmem>>)
      %c5_i32_54 = arith.constant 5 : i32
      %c0_i32_55 = arith.constant 0 : i32
      %69 = tpu.memref_slice %arg2[%34, %c0_i32_55] : memref<200x128xf32, #tpu.memory_space<any>> -> memref<1x128xf32, #tpu.memory_space<any>>
      %c5_i32_56 = arith.constant 5 : i32
      %c0_i32_57 = arith.constant 0 : i32
      %70 = tpu.memref_slice %arg16[%c5_i32_56, %c0_i32_57] : memref<8x128xf32, #tpu.memory_space<vmem>> -> memref<1x128xf32, #tpu.memory_space<vmem>>
      %71 = tpu.memref_slice %arg18[%c5_i32_54] : memref<8x!tpu.dma_semaphore, #tpu.memory_space<semaphore_mem>> -> memref<1x!tpu.dma_semaphore, #tpu.memory_space<semaphore_mem>>
      %72 = tpu.memref_squeeze %71 : memref<1x!tpu.dma_semaphore, #tpu.memory_space<semaphore_mem>> -> memref<!tpu.dma_semaphore, #tpu.memory_space<semaphore_mem>>
      tpu.wait_dma2 semaphore(%72 : memref<!tpu.dma_semaphore, #tpu.memory_space<semaphore_mem>>) src(%69 : memref<1x128xf32, #tpu.memory_space<any>>) dst(%70 : memref<1x128xf32, #tpu.memory_space<vmem>>)
      %c6_i32_58 = arith.constant 6 : i32
      %c0_i32_59 = arith.constant 0 : i32
      %73 = tpu.memref_slice %arg2[%39, %c0_i32_59] : memref<200x128xf32, #tpu.memory_space<any>> -> memref<1x128xf32, #tpu.memory_space<any>>
      %c6_i32_60 = arith.constant 6 : i32
      %c0_i32_61 = arith.constant 0 : i32
      %74 = tpu.memref_slice %arg16[%c6_i32_60, %c0_i32_61] : memref<8x128xf32, #tpu.memory_space<vmem>> -> memref<1x128xf32, #tpu.memory_space<vmem>>
      %75 = tpu.memref_slice %arg18[%c6_i32_58] : memref<8x!tpu.dma_semaphore, #tpu.memory_space<semaphore_mem>> -> memref<1x!tpu.dma_semaphore, #tpu.memory_space<semaphore_mem>>
      %76 = tpu.memref_squeeze %75 : memref<1x!tpu.dma_semaphore, #tpu.memory_space<semaphore_mem>> -> memref<!tpu.dma_semaphore, #tpu.memory_space<semaphore_mem>>
      tpu.wait_dma2 semaphore(%76 : memref<!tpu.dma_semaphore, #tpu.memory_space<semaphore_mem>>) src(%73 : memref<1x128xf32, #tpu.memory_space<any>>) dst(%74 : memref<1x128xf32, #tpu.memory_space<vmem>>)
      %c7_i32_62 = arith.constant 7 : i32
      %c0_i32_63 = arith.constant 0 : i32
      %77 = tpu.memref_slice %arg2[%44, %c0_i32_63] : memref<200x128xf32, #tpu.memory_space<any>> -> memref<1x128xf32, #tpu.memory_space<any>>
      %c7_i32_64 = arith.constant 7 : i32
      %c0_i32_65 = arith.constant 0 : i32
      %78 = tpu.memref_slice %arg16[%c7_i32_64, %c0_i32_65] : memref<8x128xf32, #tpu.memory_space<vmem>> -> memref<1x128xf32, #tpu.memory_space<vmem>>
      %79 = tpu.memref_slice %arg18[%c7_i32_62] : memref<8x!tpu.dma_semaphore, #tpu.memory_space<semaphore_mem>> -> memref<1x!tpu.dma_semaphore, #tpu.memory_space<semaphore_mem>>
      %80 = tpu.memref_squeeze %79 : memref<1x!tpu.dma_semaphore, #tpu.memory_space<semaphore_mem>> -> memref<!tpu.dma_semaphore, #tpu.memory_space<semaphore_mem>>
      tpu.wait_dma2 semaphore(%80 : memref<!tpu.dma_semaphore, #tpu.memory_space<semaphore_mem>>) src(%77 : memref<1x128xf32, #tpu.memory_space<any>>) dst(%78 : memref<1x128xf32, #tpu.memory_space<vmem>>)
      %81 = tpu.iota {dimensions = array<i32: 0>} : vector<8x1xi32>
      %c4_i32_66 = arith.constant 4 : i32
      %82 = vector.broadcast %c4_i32_66 : i32 to vector<8x1xi32>
      %83 = arith.cmpi slt, %81, %82 : vector<8x1xi32>
      %84 = arith.extui %83 : vector<8x1xi1> to vector<8x1xi32>
      %85 = arith.sitofp %84 : vector<8x1xi32> to vector<8x1xf32>
      %c0_67 = arith.constant 0 : index
      %c0_68 = arith.constant 0 : index
      %86 = vector.load %arg16[%c0_67, %c0_68] : memref<8x128xf32, #tpu.memory_space<vmem>>, vector<8x128xf32>
      %87 = arith.truncf %86 : vector<8x128xf32> to vector<8x128xbf16>
      %c0_69 = arith.constant 0 : index
      %c0_70 = arith.constant 0 : index
      %c0_71 = arith.constant 0 : index
      %88 = vector.load %arg13[%c0_69, %c0_70, %c0_71] : memref<2x8x128xf32, #tpu.memory_space<vmem>>, vector<1x8x128xf32>
      %89 = vector.shape_cast %88 : vector<1x8x128xf32> to vector<8x128xf32>
      %c0_72 = arith.constant 0 : index
      %c0_73 = arith.constant 0 : index
      %90 = vector.load %arg3[%c0_72, %c0_73] : memref<128x384xbf16, #tpu.memory_space<vmem>>, vector<128x384xbf16>
      %cst_74 = arith.constant dense<0.000000e+00> : vector<8x384xf32>
      %91 = tpu.matmul %87, %90, %cst_74 {dimension_numbers = #tpu.dot_dimension_numbers<[1], [0], [0], [1], [0, 0, 1, 1], [], []>} : vector<8x128xbf16>, vector<128x384xbf16>, vector<8x384xf32> -> vector<8x384xf32>
      %c0_75 = arith.constant 0 : index
      %c0_76 = arith.constant 0 : index
      %92 = vector.load %arg5[%c0_75, %c0_76] : memref<8x384xf32, #tpu.memory_space<vmem>>, vector<8x384xf32>
      %93 = arith.addf %91, %92 : vector<8x384xf32>
      %94 = arith.truncf %89 : vector<8x128xf32> to vector<8x128xbf16>
      %c0_77 = arith.constant 0 : index
      %c0_78 = arith.constant 0 : index
      %95 = vector.load %arg4[%c0_77, %c0_78] : memref<128x384xbf16, #tpu.memory_space<vmem>>, vector<128x384xbf16>
      %cst_79 = arith.constant dense<0.000000e+00> : vector<8x384xf32>
      %96 = tpu.matmul %94, %95, %cst_79 {dimension_numbers = #tpu.dot_dimension_numbers<[1], [0], [0], [1], [0, 0, 1, 1], [], []>} : vector<8x128xbf16>, vector<128x384xbf16>, vector<8x384xf32> -> vector<8x384xf32>
      %c0_80 = arith.constant 0 : index
      %c0_81 = arith.constant 0 : index
      %97 = vector.load %arg6[%c0_80, %c0_81] : memref<8x384xf32, #tpu.memory_space<vmem>>, vector<8x384xf32>
      %98 = arith.addf %96, %97 : vector<8x384xf32>
      %99 = vector.extract_strided_slice %93 {offsets = [0, 0], sizes = [8, 128], strides = [1, 1]} : vector<8x384xf32> to vector<8x128xf32>
      %100 = vector.extract_strided_slice %98 {offsets = [0, 0], sizes = [8, 128], strides = [1, 1]} : vector<8x384xf32> to vector<8x128xf32>
      %101 = arith.addf %99, %100 : vector<8x128xf32>
      %102 = arith.negf %101 : vector<8x128xf32>
      %103 = math.exp %102 : vector<8x128xf32>
      %cst_82 = arith.constant 1.000000e+00 : f32
      %104 = vector.broadcast %cst_82 : f32 to vector<8x128xf32>
      %105 = arith.addf %104, %103 : vector<8x128xf32>
      %106 = arith.divf %104, %105 : vector<8x128xf32>
      %107 = vector.extract_strided_slice %93 {offsets = [0, 128], sizes = [8, 128], strides = [1, 1]} : vector<8x384xf32> to vector<8x128xf32>
      %108 = vector.extract_strided_slice %98 {offsets = [0, 128], sizes = [8, 128], strides = [1, 1]} : vector<8x384xf32> to vector<8x128xf32>
      %109 = arith.addf %107, %108 : vector<8x128xf32>
      %110 = arith.negf %109 : vector<8x128xf32>
      %111 = math.exp %110 : vector<8x128xf32>
      %cst_83 = arith.constant 1.000000e+00 : f32
      %112 = vector.broadcast %cst_83 : f32 to vector<8x128xf32>
      %113 = arith.addf %112, %111 : vector<8x128xf32>
      %114 = arith.divf %112, %113 : vector<8x128xf32>
      %115 = vector.extract_strided_slice %93 {offsets = [0, 256], sizes = [8, 128], strides = [1, 1]} : vector<8x384xf32> to vector<8x128xf32>
      %116 = vector.extract_strided_slice %98 {offsets = [0, 256], sizes = [8, 128], strides = [1, 1]} : vector<8x384xf32> to vector<8x128xf32>
      %117 = arith.mulf %106, %116 : vector<8x128xf32>
      %118 = arith.addf %115, %117 : vector<8x128xf32>
      %119 = math.tanh %118 : vector<8x128xf32>
      %120 = arith.subf %89, %119 : vector<8x128xf32>
      %121 = arith.mulf %114, %120 : vector<8x128xf32>
      %122 = arith.addf %119, %121 : vector<8x128xf32>
      %123 = vector.broadcast %85 : vector<8x1xf32> to vector<8x128xf32>
      %124 = arith.mulf %122, %123 : vector<8x128xf32>
      %c0_84 = arith.constant 0 : index
      %c0_85 = arith.constant 0 : index
      %c0_86 = arith.constant 0 : index
      %125 = vector.load %arg15[%c0_84, %c0_85, %c0_86] : memref<2x8x128xf32, #tpu.memory_space<vmem>>, vector<1x8x128xf32>
      %126 = vector.shape_cast %125 : vector<1x8x128xf32> to vector<8x128xf32>
      %127 = vector.shape_cast %124 : vector<8x128xf32> to vector<1x8x128xf32>
      tpu.vector_store %arg15[%c0_84, %c0_85, %c0_86], %127 {strides = array<i32>} : memref<2x8x128xf32, #tpu.memory_space<vmem>>, vector<1x8x128xf32>,
      %128 = arith.truncf %124 : vector<8x128xf32> to vector<8x128xbf16>
      %c1_87 = arith.constant 1 : index
      %c0_88 = arith.constant 0 : index
      %c0_89 = arith.constant 0 : index
      %129 = vector.load %arg13[%c1_87, %c0_88, %c0_89] : memref<2x8x128xf32, #tpu.memory_space<vmem>>, vector<1x8x128xf32>
      %130 = vector.shape_cast %129 : vector<1x8x128xf32> to vector<8x128xf32>
      %c0_90 = arith.constant 0 : index
      %c0_91 = arith.constant 0 : index
      %131 = vector.load %arg7[%c0_90, %c0_91] : memref<128x384xbf16, #tpu.memory_space<vmem>>, vector<128x384xbf16>
      %cst_92 = arith.constant dense<0.000000e+00> : vector<8x384xf32>
      %132 = tpu.matmul %128, %131, %cst_92 {dimension_numbers = #tpu.dot_dimension_numbers<[1], [0], [0], [1], [0, 0, 1, 1], [], []>} : vector<8x128xbf16>, vector<128x384xbf16>, vector<8x384xf32> -> vector<8x384xf32>
      %c0_93 = arith.constant 0 : index
      %c0_94 = arith.constant 0 : index
      %133 = vector.load %arg9[%c0_93, %c0_94] : memref<8x384xf32, #tpu.memory_space<vmem>>, vector<8x384xf32>
      %134 = arith.addf %132, %133 : vector<8x384xf32>
      %135 = arith.truncf %130 : vector<8x128xf32> to vector<8x128xbf16>
      %c0_95 = arith.constant 0 : index
      %c0_96 = arith.constant 0 : index
      %136 = vector.load %arg8[%c0_95, %c0_96] : memref<128x384xbf16, #tpu.memory_space<vmem>>, vector<128x384xbf16>
      %cst_97 = arith.constant dense<0.000000e+00> : vector<8x384xf32>
      %137 = tpu.matmul %135, %136, %cst_97 {dimension_numbers = #tpu.dot_dimension_numbers<[1], [0], [0], [1], [0, 0, 1, 1], [], []>} : vector<8x128xbf16>, vector<128x384xbf16>, vector<8x384xf32> -> vector<8x384xf32>
      %c0_98 = arith.constant 0 : index
      %c0_99 = arith.constant 0 : index
      %138 = vector.load %arg10[%c0_98, %c0_99] : memref<8x384xf32, #tpu.memory_space<vmem>>, vector<8x384xf32>
      %139 = arith.addf %137, %138 : vector<8x384xf32>
      %140 = vector.extract_strided_slice %134 {offsets = [0, 0], sizes = [8, 128], strides = [1, 1]} : vector<8x384xf32> to vector<8x128xf32>
      %141 = vector.extract_strided_slice %139 {offsets = [0, 0], sizes = [8, 128], strides = [1, 1]} : vector<8x384xf32> to vector<8x128xf32>
      %142 = arith.addf %140, %141 : vector<8x128xf32>
      %143 = arith.negf %142 : vector<8x128xf32>
      %144 = math.exp %143 : vector<8x128xf32>
      %cst_100 = arith.constant 1.000000e+00 : f32
      %145 = vector.broadcast %cst_100 : f32 to vector<8x128xf32>
      %146 = arith.addf %145, %144 : vector<8x128xf32>
      %147 = arith.divf %145, %146 : vector<8x128xf32>
      %148 = vector.extract_strided_slice %134 {offsets = [0, 128], sizes = [8, 128], strides = [1, 1]} : vector<8x384xf32> to vector<8x128xf32>
      %149 = vector.extract_strided_slice %139 {offsets = [0, 128], sizes = [8, 128], strides = [1, 1]} : vector<8x384xf32> to vector<8x128xf32>
      %150 = arith.addf %148, %149 : vector<8x128xf32>
      %151 = arith.negf %150 : vector<8x128xf32>
      %152 = math.exp %151 : vector<8x128xf32>
      %cst_101 = arith.constant 1.000000e+00 : f32
      %153 = vector.broadcast %cst_101 : f32 to vector<8x128xf32>
      %154 = arith.addf %153, %152 : vector<8x128xf32>
      %155 = arith.divf %153, %154 : vector<8x128xf32>
      %156 = vector.extract_strided_slice %134 {offsets = [0, 256], sizes = [8, 128], strides = [1, 1]} : vector<8x384xf32> to vector<8x128xf32>
      %157 = vector.extract_strided_slice %139 {offsets = [0, 256], sizes = [8, 128], strides = [1, 1]} : vector<8x384xf32> to vector<8x128xf32>
      %158 = arith.mulf %147, %157 : vector<8x128xf32>
      %159 = arith.addf %156, %158 : vector<8x128xf32>
      %160 = math.tanh %159 : vector<8x128xf32>
      %161 = arith.subf %130, %160 : vector<8x128xf32>
      %162 = arith.mulf %155, %161 : vector<8x128xf32>
      %163 = arith.addf %160, %162 : vector<8x128xf32>
      %164 = vector.broadcast %85 : vector<8x1xf32> to vector<8x128xf32>
      %165 = arith.mulf %163, %164 : vector<8x128xf32>
      %c1_102 = arith.constant 1 : index
      %c0_103 = arith.constant 0 : index
      %c0_104 = arith.constant 0 : index
      %166 = vector.load %arg15[%c1_102, %c0_103, %c0_104] : memref<2x8x128xf32, #tpu.memory_space<vmem>>, vector<1x8x128xf32>
      %167 = vector.shape_cast %166 : vector<1x8x128xf32> to vector<8x128xf32>
      %168 = vector.shape_cast %165 : vector<8x128xf32> to vector<1x8x128xf32>
      tpu.vector_store %arg15[%c1_102, %c0_103, %c0_104], %168 {strides = array<i32>} : memref<2x8x128xf32, #tpu.memory_space<vmem>>, vector<1x8x128xf32>,
      %169 = arith.truncf %165 : vector<8x128xf32> to vector<8x128xbf16>
      %c0_105 = arith.constant 0 : index
      %c0_106 = arith.constant 0 : index
      %170 = vector.load %arg17[%c0_105, %c0_106] : memref<8x128xbf16, #tpu.memory_space<vmem>>, vector<8x128xbf16>
      tpu.vector_store %arg17[%c0_105, %c0_106], %169 {strides = array<i32>} : memref<8x128xbf16, #tpu.memory_space<vmem>>, vector<8x128xbf16>,
    } else {
    }
    %c0 = arith.constant 0 : index
    %c0_1 = arith.constant 0 : index
    %3 = vector.load %arg17[%c0, %c0_1] : memref<8x128xbf16, #tpu.memory_space<vmem>>, vector<8x128xbf16>
    %c0_2 = arith.constant 0 : index
    %c0_3 = arith.constant 0 : index
    %4 = vector.load %arg11[%c0_2, %c0_3] : memref<128x128xbf16, #tpu.memory_space<vmem>>, vector<128x128xbf16>
    %cst = arith.constant dense<0.000000e+00> : vector<8x128xf32>
    %5 = tpu.matmul %3, %4, %cst {dimension_numbers = #tpu.dot_dimension_numbers<[1], [0], [0], [1], [0, 0, 1, 1], [], []>} : vector<8x128xbf16>, vector<128x128xbf16>, vector<8x128xf32> -> vector<8x128xf32>
    %c0_4 = arith.constant 0 : index
    %c0_5 = arith.constant 0 : index
    %6 = vector.load %arg12[%c0_4, %c0_5] : memref<8x128xf32, #tpu.memory_space<vmem>>, vector<8x128xf32>
    %7 = arith.addf %5, %6 : vector<8x128xf32>
    %c0_6 = arith.constant 0 : index
    %c0_7 = arith.constant 0 : index
    %8 = vector.load %arg14[%c0_6, %c0_7] : memref<8x128xf32, #tpu.memory_space<vmem>>, vector<8x128xf32>
    tpu.vector_store %arg14[%c0_6, %c0_7], %7 {strides = array<i32>} : memref<8x128xf32, #tpu.memory_space<vmem>>, vector<8x128xf32>,
    return
  }
  func.func @transform_0(%arg0: i32) -> i32 {
    %c0_i32 = arith.constant 0 : i32
    %c0_i32_0 = arith.constant 0 : i32
    return %c0_i32 : i32
  }
  func.func @transform_2(%arg0: i32) -> (i32, i32) {
    %c0_i32 = arith.constant 0 : i32
    %c0_i32_0 = arith.constant 0 : i32
    %c0_i32_1 = arith.constant 0 : i32
    return %c0_i32, %c0_i32_0 : i32, i32
  }
  func.func @transform_3(%arg0: i32) -> (i32, i32) {
    %c0_i32 = arith.constant 0 : i32
    %c0_i32_0 = arith.constant 0 : i32
    %c0_i32_1 = arith.constant 0 : i32
    return %c0_i32, %c0_i32_0 : i32, i32
  }
  func.func @transform_4(%arg0: i32) -> (i32, i32) {
    %c0_i32 = arith.constant 0 : i32
    %c0_i32_0 = arith.constant 0 : i32
    %c0_i32_1 = arith.constant 0 : i32
    return %c0_i32, %c0_i32_0 : i32, i32
  }
  func.func @transform_5(%arg0: i32) -> (i32, i32) {
    %c0_i32 = arith.constant 0 : i32
    %c0_i32_0 = arith.constant 0 : i32
    %c0_i32_1 = arith.constant 0 : i32
    return %c0_i32, %c0_i32_0 : i32, i32
  }
  func.func @transform_6(%arg0: i32) -> (i32, i32) {
    %c0_i32 = arith.constant 0 : i32
    %c0_i32_0 = arith.constant 0 : i32
    %c0_i32_1 = arith.constant 0 : i32
    return %c0_i32, %c0_i32_0 : i32, i32
  }
  func.func @transform_7(%arg0: i32) -> (i32, i32) {
    %c0_i32 = arith.constant 0 : i32
    %c0_i32_0 = arith.constant 0 : i32
    %c0_i32_1 = arith.constant 0 : i32
    return %c0_i32, %c0_i32_0 : i32, i32
  }
  func.func @transform_8(%arg0: i32) -> (i32, i32) {
    %c0_i32 = arith.constant 0 : i32
    %c0_i32_0 = arith.constant 0 : i32
    %c0_i32_1 = arith.constant 0 : i32
    return %c0_i32, %c0_i32_0 : i32, i32
  }
  func.func @transform_9(%arg0: i32) -> (i32, i32) {
    %c0_i32 = arith.constant 0 : i32
    %c0_i32_0 = arith.constant 0 : i32
    %c0_i32_1 = arith.constant 0 : i32
    return %c0_i32, %c0_i32_0 : i32, i32
  }
  func.func @transform_10(%arg0: i32) -> (i32, i32) {
    %c0_i32 = arith.constant 0 : i32
    %c0_i32_0 = arith.constant 0 : i32
    return %c0_i32, %arg0 : i32, i32
  }
  func.func @transform_11(%arg0: i32) -> (i32, i32) {
    %c0_i32 = arith.constant 0 : i32
    %c0_i32_0 = arith.constant 0 : i32
    return %c0_i32, %arg0 : i32, i32
  }
  func.func @transform_12(%arg0: i32) -> (i32, i32, i32) {
    %c0_i32 = arith.constant 0 : i32
    %c0_i32_0 = arith.constant 0 : i32
    %c0_i32_1 = arith.constant 0 : i32
    %c0_i32_2 = arith.constant 0 : i32
    return %c0_i32, %c0_i32_0, %c0_i32_1 : i32, i32, i32
  }
  func.func @transform_13(%arg0: i32) -> (i32, i32) {
    %c0_i32 = arith.constant 0 : i32
    %c0_i32_0 = arith.constant 0 : i32
    return %c0_i32, %arg0 : i32, i32
  }
  func.func @transform_14(%arg0: i32) -> (i32, i32, i32) {
    %c0_i32 = arith.constant 0 : i32
    %c0_i32_0 = arith.constant 0 : i32
    %c0_i32_1 = arith.constant 0 : i32
    %c0_i32_2 = arith.constant 0 : i32
    return %c0_i32, %c0_i32_0, %c0_i32_1 : i32, i32, i32
  }
}

</mosaic_0001>

<bundles_post_ra>
// kernel: decoder_forward.1
= control target key start
LH: loop header
LB: loop body
LE: loop exit
PB: predicated region body
PF: predicated region fallthrough
CT: control target
= control target key end

     0   :  { %s4084_s0 = inlined_call_operand.vmem [shape: s32[8], index: 0, kind: input, shape index: {}]   ;;  %s4085_s1 = inlined_call_operand.hbm [shape: f32[200,128], index: 1, kind: input, shape index: {}]   ;;  %s4086_s2 = inlined_call_operand.hbm [shape: bf16[128,384], index: 2, kind: input, shape index: {}]   ;;  %s4087_s3 = inlined_call_operand.hbm [shape: bf16[128,384], index: 3, kind: input, shape index: {}]   ;;  %s4088_s4 = inlined_call_operand.vmem [shape: f32[8,384], index: 4, kind: input, shape index: {}]   ;;  %s4089_s5 = inlined_call_operand.vmem [shape: f32[8,384], index: 5, kind: input, shape index: {}]   ;;  %s4090_s6 = inlined_call_operand.hbm [shape: bf16[128,384], index: 6, kind: input, shape index: {}]   ;;  %s4091_s7 = inlined_call_operand.hbm [shape: bf16[128,384], index: 7, kind: input, shape index: {}]   ;;  %s4092_s8 = inlined_call_operand.hbm [shape: f32[8,384], index: 8, kind: input, shape index: {}]   ;;  %s4093_s9 = inlined_call_operand.hbm [shape: f32[8,384], index: 9, kind: input, shape index: {}]   ;;  %s4094_s10 = inlined_call_operand.hbm [shape: bf16[128,256], index: 10, kind: input, shape index: {}]   ;;  %s4095_s11 = inlined_call_operand.vmem [shape: f32[8,256], index: 11, kind: input, shape index: {}]   ;;  %s4096_s12 = inlined_call_operand.hbm [shape: f32[2,8,128], index: 12, kind: input, shape index: {}, may-alias: {12,14}]   ;;  %s4097_s13 = inlined_call_operand.hbm [shape: f32[8,256], index: 13, kind: output, shape index: {0}]   ;;  %s4098_s14 = inlined_call_operand.hbm [shape: f32[2,8,128], index: 14, kind: output, shape index: {1}, may-alias: {12,14}]  }
   0x1   :  { %4109 = sst [smem:[#allocation60_spill]] %s4084_s0 }
   0x2   :  { %4110 = sst [smem:[#allocation61_spill]] %s4085_s1 }
   0x3   :  { %4111 = sst [smem:[#allocation62_spill]] %s4086_s2 }
   0x4   :  { %4112 = sst [smem:[#allocation63_spill]] %s4087_s3 }
   0x5   :  { %4113 = sst [smem:[#allocation64_spill]] %s4088_s4 }
   0x6   :  { %4114 = sst [smem:[#allocation65_spill]] %s4089_s5 }
   0x7   :  { %4115 = sst [smem:[#allocation66_spill]] %s4090_s6 }
   0x8   :  { %4116 = sst [smem:[#allocation67_spill]] %s4091_s7 }
   0x9   :  { %4117 = sst [smem:[#allocation68_spill]] %s4092_s8 }
   0xa   :  { %4118 = sst [smem:[#allocation69_spill]] %s4093_s9 }
   0xb   :  { %4119 = sst [smem:[#allocation70_spill]] %s4094_s10 }
   0xc   :  { %4120 = sst [smem:[#allocation71_spill]] %s4095_s11 }
   0xd   :  { %4121 = sst [smem:[#allocation72_spill]] %s4096_s12 }
   0xe   :  { %4122 = sst [smem:[#allocation73_spill]] %s4097_s13 }
   0xf   :  { %4123 = sst [smem:[#allocation74_spill]] %s4098_s14 }
  0x10   :  { %20 = vsyncpa [#allocation8], 0 }
  0x11   :  { %21 = vsyncpa [#allocation6], 0 }
  0x12   :  { %22 = vsyncpa [#allocation11], 0 }
  0x13   :  { %23 = vsyncpa [#allocation14], 0 }
  0x14   :  { %24 = vsyncpa [#allocation17], 0 }
  0x15   :  { %25 = vsyncpa [#allocation7], 0 }
  0x16   :  { %27 = vsyncpa [#allocation7 + $0x1], 0 }
  0x17   :  { %28 = vsyncpa [#allocation22], 0  ;;  %s3458_s29 = smov 0   ;;  %s3460_s30 = smov 0  }
  0x18   :  { %s3462_s15 = smov 0   ;;  %s3464_s16 = smov 0  }
  0x19 LB: > { %4124 = sst [smem:[#allocation58_spill]] %s3345_s15  ;;  %s3479_s17 = sadd.s32 4294967295, %s3349_s16   ;;  %s3349_s16 = sphi %s3464_s16, %s4176_s16   ;;  %s3345_s15 = sphi %s3462_s15, %s4173_s15   ;;  %s3341_s30 = sphi %s3460_s30, %s4175_s30   ;;  %s3337_s29 = sphi %s3458_s29, %s4174_s29  }
  0x1a   : > { %p2145_p0 = scmp.ge.s32.totalorder %s3349_s16, 1  ;;  %p4104_p1 = scmp.eq.s32.totalorder %s3479_s17, 0 }
  0x1b   : > { %p348_p2 = scmp.lt.s32.totalorder %s3349_s16, 3  ;;  %s3351_s19 = smov [#allocation10]  }
  0x1c   : > { %s384_s20 = sshll.u32 %s3351_s19, 4  ;;  %s3352_s21 = smov [#allocation9]   ;;  %s3489_s20 = int_to_ptr.vmem [resolvable:$true] %s384_s20 }
  0x1d   : > { %p3485_p4 = pnand %p2145_p0, %p348_p2  ;;  %s371_s22 = sshll.u32 %s3352_s21, 4  ;;  %s3500_s22 = int_to_ptr.vmem [resolvable:$true] %s371_s22 }
  0x1e   : > { %s3353_s24 = smov [#allocation12]   ;;  %s4127_s3 = sld [smem:[#allocation63_spill]] }
  0x1f   : > { %s4125_s18 = scalar_select %p3485_p4, 1, 0 }
  0x20   : > { %p2509_p6 = pneg %p3485_p4  ;;  %s403_s25 = sshll.u32 %s3353_s24, 4  ;;  %s3502_s25 = int_to_ptr.vmem [resolvable:$true] %s403_s25 }
  0x22   : > { %p3496_p7 = pnand %p2509_p6, %p4104_p1 }
  0x24   : > { %s2780_s28 = scalar_lea.hbm %s4127_s3, 3072  ;;  %p3512_p9 = pneg %p3496_p7 }
  0x25   : > { %p2781_p8 = scmp.ne.s32.totalorder %s4127_s3, %s2780_s28  ;;  %p2787_p12 = scmp.lt.u32.totalorder %s2780_s28, %s4127_s3 }
  0x27   : > { %p2783_p10 = pnand %p3512_p9, %p2781_p8 }
  0x29   : > { %p2784_p11 = pneg %p2783_p10 }
  0x2b   : > { %p2789_p13 = pnand %p2787_p12, %p2784_p11 }
  0x2d   : > { %2792 = shalt.err (!%p2789_p13)
}
  0x2e   : > { %s2793_s13 = scalar_lea.vmem %s3489_s20, 3072  ;;  %p2801_p5 = scmp.lt.s32.totalorder %s3489_s20, %s3489_s20 }
  0x2f   : > { %p2794_p0 = scmp.ne.s32.totalorder %s3489_s20, %s2793_s13  ;;  %p2802_p3 = scmp.lt.s32.totalorder %s2793_s13, %s2793_s13 }
  0x31   : > { %p2796_p2 = pnand %p2794_p0, %p3512_p9  ;;  %p2803_p8 = por %p2802_p3, %p2801_p5 }
  0x33   : > { %p2797_p6 = pneg %p2796_p2 }
  0x35   : > { %p2804_p10 = pnand %p2803_p8, %p2797_p6 }
  0x37   : > { %2807 = shalt.err (!%p2804_p10)
}
  0x38   : > { %s3354_s26 = smov 192   ;;  %s3355_s14 = smov 12  }
  0x39   : > { %2518 = dma.hbm_to_vmem [thread:$0]  (!%p3496_p7), %s4127_s3, 3072, %s3489_s20, [#allocation11], %s3354_s26, %s3354_s26, %s3355_s14  }
  0x3a   : > { %s4129_s2 = sld [smem:[#allocation62_spill]] }
  0x40   : > { %s2808_s13 = scalar_lea.hbm %s4129_s2, 3072 }
  0x41   : > { %p2809_p3 = scmp.ne.s32.totalorder %s4129_s2, %s2808_s13  ;;  %p2815_p12 = scmp.lt.u32.totalorder %s2808_s13, %s4129_s2 }
  0x43   : > { %p2811_p5 = pnand %p2809_p3, %p3512_p9 }
  0x45   : > { %p2812_p11 = pneg %p2811_p5 }
  0x47   : > { %p2817_p13 = pnand %p2815_p12, %p2812_p11 }
  0x49   : > { %2820 = shalt.err (!%p2817_p13)
}
  0x4a   : > { %s2821_s20 = scalar_lea.vmem %s3500_s22, 3072  ;;  %p2829_p8 = scmp.lt.s32.totalorder %s3500_s22, %s3500_s22 }
  0x4b   : > { %p2822_p0 = scmp.ne.s32.totalorder %s3500_s22, %s2821_s20  ;;  %p2830_p10 = scmp.lt.s32.totalorder %s2821_s20, %s2821_s20 }
  0x4d   : > { %p2824_p2 = pnand %p2822_p0, %p3512_p9  ;;  %p2831_p3 = por %p2830_p10, %p2829_p8 }
  0x4f   : > { %p2825_p6 = pneg %p2824_p2 }
  0x51   : > { %p2832_p5 = pnand %p2831_p3, %p2825_p6 }
  0x53   : > { %2835 = shalt.err (!%p2832_p5)
}
  0x54   : > { %2515 = dma.hbm_to_vmem [thread:$0]  (!%p3496_p7), %s4129_s2, 3072, %s3500_s22, [#allocation6], %s3354_s26, %s3354_s26, %s3355_s14  }
  0x55   : > { %s4130_s6 = sld [smem:[#allocation66_spill]] }
  0x5b   : > { %s2836_s27 = scalar_lea.hbm %s4130_s6, 3072 }
  0x5c   : > { %p2837_p11 = scmp.ne.s32.totalorder %s4130_s6, %s2836_s27  ;;  %p2843_p0 = scmp.lt.u32.totalorder %s2836_s27, %s4130_s6 }
  0x5e   : > { %p2839_p12 = pnand %p2837_p11, %p3512_p9 }
  0x60   : > { %p2840_p13 = pneg %p2839_p12 }
  0x62   : > { %p2845_p2 = pnand %p2843_p0, %p2840_p13 }
  0x64   : > { %2848 = shalt.err (!%p2845_p2)
}
  0x65   : > { %s2849_s22 = scalar_lea.vmem %s3502_s25, 3072  ;;  %p2857_p3 = scmp.lt.s32.totalorder %s3502_s25, %s3502_s25 }
  0x66   : > { %p2850_p6 = scmp.ne.s32.totalorder %s3502_s25, %s2849_s22  ;;  %p2858_p5 = scmp.lt.s32.totalorder %s2849_s22, %s2849_s22 }
  0x68   : > { %p2852_p8 = pnand %p2850_p6, %p3512_p9  ;;  %p2859_p11 = por %p2858_p5, %p2857_p3 }
  0x6a   : > { %p2853_p10 = pneg %p2852_p8 }
  0x6c   : > { %p2860_p12 = pnand %p2859_p11, %p2853_p10 }
  0x6e   : > { %2863 = shalt.err (!%p2860_p12)
}
  0x6f   : > { %2521 = dma.hbm_to_vmem [thread:$0]  (!%p3496_p7), %s4130_s6, 3072, %s3502_s25, [#allocation11], %s3354_s26, %s3354_s26, %s3355_s14  }
  0x70   : > { %s3356_s4 = smov [#allocation13]   ;;  %s4131_s0 = sld [smem:[#allocation60_spill]] }
  0x71   : > { %s416_s5 = sshll.u32 %s3356_s4, 4  ;;  %s4132_s7 = sld [smem:[#allocation67_spill]]  ;;  %s417_s5 = int_to_ptr.vmem [resolvable:$true] %s416_s5 }
  0x76   : > { %s361_s28 = sshll.u32 %s4131_s0, 4  ;;  %s362_s28 = int_to_ptr.vmem [resolvable:$true] %s361_s28 }
  0x77   : > { %s2864_s13 = scalar_lea.hbm %s4132_s7, 3072 }
  0x78   : > { %p2865_p13 = scmp.ne.s32.totalorder %s4132_s7, %s2864_s13  ;;  %p2871_p6 = scmp.lt.u32.totalorder %s2864_s13, %s4132_s7 }
  0x7a   : > { %p2867_p0 = pnand %p2865_p13, %p3512_p9 }
  0x7c   : > { %p2868_p2 = pneg %p2867_p0 }
  0x7e   : > { %p2873_p8 = pnand %p2871_p6, %p2868_p2 }
  0x80   : > { %2876 = shalt.err (!%p2873_p8)
}
  0x81   : > { %s2877_s1 = scalar_lea.vmem %s417_s5, 3072  ;;  %p2885_p11 = scmp.lt.s32.totalorder %s417_s5, %s417_s5 }
  0x82   : > { %p2878_p10 = scmp.ne.s32.totalorder %s417_s5, %s2877_s1  ;;  %p2886_p12 = scmp.lt.s32.totalorder %s2877_s1, %s2877_s1 }
  0x84   : > { %p2880_p3 = pnand %p2878_p10, %p3512_p9  ;;  %p2887_p1 = por %p2886_p12, %p2885_p11 }
  0x86   : > { %p2881_p5 = pneg %p2880_p3 }
  0x88   : > { %p2888_p4 = pnand %p2887_p1, %p2881_p5 }
  0x8a   : > { %2891 = shalt.err (!%p2888_p4)
}
  0x8b   : > { %2524 = dma.hbm_to_vmem [thread:$0]  (!%p3496_p7), %s4132_s7, 3072, %s417_s5, [#allocation14], %s3354_s26, %s3354_s26, %s3355_s14  }
  0x8c   : > { %s2892_s11 = scalar_lea.vmem %s362_s28, 16  ;;  %p2900_p6 = scmp.lt.s32.totalorder %s362_s28, %s362_s28 }
  0x8d   : > { %p2893_p13 = scmp.ne.s32.totalorder %s362_s28, %s2892_s11  ;;  %p2901_p8 = scmp.lt.s32.totalorder %s2892_s11, %s2892_s11 }
  0x8f   : > { %p2895_p0 = pnand %p2893_p13, %p3512_p9  ;;  %p2902_p10 = por %p2901_p8, %p2900_p6 }
  0x91   : > { %p2896_p2 = pneg %p2895_p0 }
  0x93   : > { %p2903_p1 = pnand %p2902_p10, %p2896_p2 }
  0x95   : > { %2906 = shalt.err (!%p2903_p1)
}
  0x96   : > { %s3357_s27 = smov [#allocation5]   ;;  %s3358_s19 = smov [#allocation15]  }
  0x97   : > { %2512 = dma.vmem_to_smem (!%p3496_p7), %s362_s28, 16, %s3357_s27, [#allocation8]  }
  0x98   : > { %s430_s24 = sshll.u32 %s3358_s19, 4  ;;  %s3359_s13 = smov [#allocation16]   ;;  %s431_s24 = int_to_ptr.vmem [resolvable:$true] %s430_s24 }
  0x99   : > { %s441_s26 = sshll.u32 %s3359_s13, 4  ;;  %s4133_s8 = sld [smem:[#allocation68_spill]]  ;;  %s442_s26 = int_to_ptr.vmem [resolvable:$true] %s441_s26 }
  0x9f   : > { %s2907_s22 = scalar_lea.hbm %s4133_s8, 384 }
  0xa0   : > { %p2908_p4 = scmp.ne.s32.totalorder %s4133_s8, %s2907_s22  ;;  %p2914_p11 = scmp.lt.u32.totalorder %s2907_s22, %s4133_s8 }
  0xa2   : > { %p2910_p3 = pnand %p2908_p4, %p3512_p9 }
  0xa4   : > { %p2911_p5 = pneg %p2910_p3 }
  0xa6   : > { %p2916_p12 = pnand %p2914_p11, %p2911_p5 }
  0xa8   : > { %2919 = shalt.err (!%p2916_p12)
}
  0xa9   : > { %s2920_s28 = scalar_lea.vmem %s431_s24, 384  ;;  %p2928_p6 = scmp.lt.s32.totalorder %s431_s24, %s431_s24 }
  0xaa   : > { %p2921_p13 = scmp.ne.s32.totalorder %s431_s24, %s2920_s28  ;;  %p2929_p8 = scmp.lt.s32.totalorder %s2920_s28, %s2920_s28 }
  0xac   : > { %p2923_p0 = pnand %p2921_p13, %p3512_p9  ;;  %p2930_p10 = por %p2929_p8, %p2928_p6 }
  0xae   : > { %p2924_p2 = pneg %p2923_p0 }
  0xb0   : > { %p2931_p1 = pnand %p2930_p10, %p2924_p2 }
  0xb2   : > { %2934 = shalt.err (!%p2931_p1)
}
  0xb3   : > { %2527 = dma.hbm_to_vmem [thread:$0]  (!%p3496_p7), %s4133_s8, 384, %s431_s24, [#allocation14]  }
  0xb4   : > { %s4134_s9 = sld [smem:[#allocation69_spill]] }
  0xba   : > { %s2935_s13 = scalar_lea.hbm %s4134_s9, 384 }
  0xbb   : > { %p2936_p4 = scmp.ne.s32.totalorder %s4134_s9, %s2935_s13  ;;  %p2942_p11 = scmp.lt.u32.totalorder %s2935_s13, %s4134_s9 }
  0xbd   : > { %p2938_p3 = pnand %p2936_p4, %p3512_p9 }
  0xbf   : > { %p2939_p5 = pneg %p2938_p3 }
  0xc1   : > { %p2944_p12 = pnand %p2942_p11, %p2939_p5 }
  0xc3   : > { %2947 = shalt.err (!%p2944_p12)
}
  0xc4   : > { %s2948_s20 = scalar_lea.vmem %s442_s26, 384  ;;  %p2956_p6 = scmp.lt.s32.totalorder %s442_s26, %s442_s26 }
  0xc5   : > { %p2949_p13 = scmp.ne.s32.totalorder %s442_s26, %s2948_s20  ;;  %p2957_p8 = scmp.lt.s32.totalorder %s2948_s20, %s2948_s20 }
  0xc7   : > { %p2951_p0 = pnand %p2949_p13, %p3512_p9  ;;  %p2958_p10 = por %p2957_p8, %p2956_p6 }
  0xc9   : > { %p2952_p2 = pneg %p2951_p0 }
  0xcb   : > { %p2959_p1 = pnand %p2958_p10, %p2952_p2 }
  0xcd   : > { %2962 = shalt.err (!%p2959_p1)
}
  0xce   : > { %2530 = dma.hbm_to_vmem [thread:$0]  (!%p3496_p7), %s4134_s9, 384, %s442_s26, [#allocation17]  }
  0xcf   : > { %s3360_s2 = smov [#allocation19]   ;;  %s4135_s12 = sld [smem:[#allocation72_spill]] }
  0xd0   : > { %s451_s28 = sshll.u32 %s3360_s2, 4  ;;  %s452_s28 = int_to_ptr.vmem [resolvable:$true] %s451_s28 }
  0xd5   : > { %s2963_s27 = scalar_lea.hbm %s4135_s12, 256 }
  0xd6   : > { %p2964_p4 = scmp.ne.s32.totalorder %s4135_s12, %s2963_s27  ;;  %p2970_p11 = scmp.lt.u32.totalorder %s2963_s27, %s4135_s12 }
  0xd8   : > { %p2966_p3 = pnand %p2964_p4, %p3512_p9 }
  0xda   : > { %p2967_p5 = pneg %p2966_p3 }
  0xdc   : > { %p2972_p12 = pnand %p2970_p11, %p2967_p5 }
  0xde   : > { %2975 = shalt.err (!%p2972_p12)
}
  0xdf   : > { %s2976_s26 = scalar_lea.vmem %s452_s28, 256  ;;  %p2984_p6 = scmp.lt.s32.totalorder %s452_s28, %s452_s28 }
  0xe0   : > { %p2977_p13 = scmp.ne.s32.totalorder %s452_s28, %s2976_s26  ;;  %p2985_p8 = scmp.lt.s32.totalorder %s2976_s26, %s2976_s26 }
  0xe2   : > { %p2979_p0 = pnand %p2977_p13, %p3512_p9  ;;  %p2986_p10 = por %p2985_p8, %p2984_p6 }
  0xe4   : > { %p2980_p2 = pneg %p2979_p0 }
  0xe6   : > { %p2987_p1 = pnand %p2986_p10, %p2980_p2 }
  0xe8   : > { %2990 = shalt.err (!%p2987_p1)
}
  0xe9   : > { %s3361_s22 = smov 128   ;;  %s3362_s21 = smov 8  }
  0xea   : > { %2533 = dma.hbm_to_vmem [thread:$0]  (!%p3496_p7), %s4135_s12, 256, %s452_s28, [#allocation11], %s3361_s22, %s3361_s22, %s3362_s21  }
  0xeb   : > { %s2144_s24 = sadd.s32 4294967294, %s3349_s16   ;;  %s3674_s1 = sadd.s32 1, %s3349_s16  }
  0xec   : > { %s227_s2 = ssub.s32 %s3349_s16, %s3674_s1  ;;  %s230_s4 = sadd.s32 1, %s3345_s15 }
  0xed   : > { %p228_p9 = scmp.eq.s32.totalorder %s227_s2, 0  ;;  %p237_p4 = scmp.ne.s32.totalorder %s3345_s15, %s3341_s30 }
  0xee   : > { %p238_p3 = scmp.eq.s32.totalorder %s3349_s16, 0  ;;  %p243_p5 = scmp.ne.s32.totalorder %s3341_s30, %s3337_s29 }
  0xef   : > { %s3685_s23 = scalar_select %p228_p9, %s3345_s15, %s230_s4  }
  0xf0   : > { %p3687_p11 = por %p238_p3, %p237_p4  ;;  %p4138_p7 = scmp.eq.s32.totalorder %s3479_s17, 0 }
  0xf1   : > { %4136 = sst [smem:[#allocation59_spill]] %s3685_s23  ;;  %p4106_p13 = scmp.eq.s32.totalorder %s3479_s17, 1 }
  0xf2   : > { %p3693_p12 = por %p4138_p7, %p243_p5  ;;  %p320_p0 = scmp.eq.s32.totalorder %s2144_s24, 1 }
  0xf3   : > { %p2550_p2 = scmp.lt.s32.totalorder %s3349_s16, 2  ;;  %s465_s27 = sand.u32 1, %s3349_s16  }
  0xf4   : > { %p3702_p6 = por %p4106_p13, %p237_p4  ;;  %p3706_p8 = por %p320_p0, %p243_p5 }
  0xf5   : > { %s467_s14 = sand.u32 1, %s3345_s15   ;;  %s2156_s26 = sshll.u32 %s3349_s16, 6 }
  0xf6   : > { %s4140_s19 = scalar_select %p3702_p6, 1, 0 }
  0xf7   : > { %s4141_s13 = scalar_select %p3706_p8, 1, 0 }
  0xf8   : > { %s2155_s5 = sshll.u32 %s467_s14, 6  ;;  %s4142_s10 = sld [smem:[#allocation70_spill]] }
  0xf9   : > { %s469_s24 = scalar_lea.vmem [#allocation18], %s2155_s5  ;;  %p3719_p10 = pnand %p2550_p2, %p3687_p11 }
  0xfa   : > { %s475_s2 = sshll.u32 %s469_s24, 4  ;;  %s3725_s14 = scalar_lea.sflag [#allocation6], %s465_s27  ;;  %s3723_s2 = int_to_ptr.vmem [resolvable:$true] %s475_s2 }
  0xfb   : > { %p2993_p9 = pneg %p3719_p10 }
  0xfe   : > { %s3715_s20 = scalar_lea.hbm %s4142_s10, %s2156_s26  ;;  %s2996_s26 = scalar_lea.hbm %s4142_s10, 2048 }
  0xff   : > { %s2991_s21 = scalar_lea.hbm %s3715_s20, 1024  ;;  %p2997_p5 = scmp.lt.u32.totalorder %s3715_s20, %s4142_s10 }
 0x100   : > { %p2992_p1 = scmp.ne.s32.totalorder %s3715_s20, %s2991_s21  ;;  %p2998_p11 = scmp.lt.u32.totalorder %s2996_s26, %s2991_s21 }
 0x101   : > { %p3000_p0 = scmp.lt.u32.totalorder %s2991_s21, %s3715_s20 }
 0x102   : > { %p2994_p4 = pnand %p2993_p9, %p2992_p1  ;;  %p2999_p7 = por %p2998_p11, %p2997_p5 }
 0x104   : > { %p2995_p3 = pneg %p2994_p4  ;;  %p3001_p2 = por %p3000_p0, %p2999_p7 }
 0x106   : > { %p3002_p13 = pnand %p3001_p2, %p2995_p3 }
 0x108   : > { %3005 = shalt.err (!%p3002_p13)
}
 0x109   : > { %s3006_s27 = scalar_lea.vmem %s3723_s2, 1024  ;;  %s3363_s5 = smov [#allocation18]  }
 0x10a   : > { %p3007_p1 = scmp.ne.s32.totalorder %s3723_s2, %s3006_s27  ;;  %s3011_s11 = sshll.u32 %s3363_s5, 4  ;;  %s3012_s11 = int_to_ptr.vmem [resolvable:$false] %s3011_s11 }
 0x10b   : > { %s3013_s25 = scalar_lea.vmem %s3012_s11, 2048  ;;  %p3014_p6 = scmp.lt.s32.totalorder %s3723_s2, %s3012_s11 }
 0x10c   : > { %p3009_p4 = pnand %p3007_p1, %p2993_p9  ;;  %p3015_p5 = scmp.lt.s32.totalorder %s3013_s25, %s3006_s27 }
 0x10e   : > { %p3010_p8 = pneg %p3009_p4  ;;  %p3016_p11 = por %p3015_p5, %p3014_p6 }
 0x110   : > { %p3017_p7 = pnand %p3016_p11, %p3010_p8 }
 0x112   : > { %3020 = shalt.err (!%p3017_p7)
}
 0x113   : > { %s3364_s21 = smov 64   ;;  %s3365_s26 = smov 4  }
 0x114   : > { %2537 = dma.hbm_to_vmem [thread:$0]  (!%p3719_p10), %s3715_s20, 1024, %s3723_s2, %s3725_s14, %s3361_s22, %s3364_s21, %s3365_s26  }
 0x115   : > { %p4144_p13 = scmp.ne.s32.totalorder %s4125_s18, 0 }
 0x116   : > { %p4145_p9 = scmp.eq.s32.totalorder (!%p4144_p13), %s3479_s17, 0 }
 0x117   : > { %494 = sbr.rel (%p4144_p13) target bundleno = 1405 (0x57d), region = 68 }
 0x11e   : > { %3284 = dma.done.wait (%p4145_p9), [#allocation8], 16   ;;  %p4146_p3 = pmov %p4145_p9 }
 0x120   : > { %3286 = vsyncadd (%p4146_p3), [#allocation8], 4294967280  ;;  %p4147_p6 = pmov %p4146_p3 }
 0x121   : > { %p4148_p8 = pmov %p4146_p3 }
 0x122   : > { %3288 = dma.done.wait (%p4147_p6), [#allocation6], 3072  }
 0x123   : > { %3290 = vsyncadd (%p4148_p8), [#allocation6], 4294964224  ;;  %p4149_p0 = pmov %p4146_p3 }
 0x125   : > { %3292 = dma.done.wait (%p4149_p0), [#allocation11], 6144   ;;  %p4150_p10 = pmov %p4149_p0 }
 0x126   : > { %p4151_p2 = pmov %p4149_p0 }
 0x127   : > { %3294 = vsyncadd (%p4150_p10), [#allocation11], 4294961152 }
 0x128   : > { %3296 = dma.done.wait (%p4151_p2), [#allocation14], 3456   ;;  %p4152_p1 = pmov %p4149_p0 }
 0x129   : > { %p4153_p4 = pmov %p4149_p0 }
 0x12a   : > { %3298 = vsyncadd (%p4152_p1), [#allocation14], 4294963840 }
 0x12b   : > { %3300 = dma.done.wait (%p4153_p4), [#allocation17], 384   ;;  %p4154_p5 = pmov %p4149_p0 }
 0x12c   : > { %s524_s18 = sand.u32 1, %s3479_s17   ;;  %s3778_s22 = sand.u32 1, %s3341_s30  }
 0x12d   : > { %3302 = vsyncadd (%p4154_p5), [#allocation17], 4294966912  ;;  %s2165_s20 = sshll.u32 %s3778_s22, 6  ;;  %s525_s2 = scalar_lea.sflag [#allocation6], %s524_s18 }
 0x12e   : > { %s3781_s4 = scalar_lea.vmem [#allocation18], %s2165_s20 }
 0x12f   : > { %3304 = dma.done.wait (%p3693_p12), %s525_s2, 1024  }
 0x130   : > { %3306 = vsyncadd (%p3693_p12), %s525_s2, 4294966272  ;;  %p4155_p11 = pmov %p4149_p0 }
 0x131   : > { %p4156_p7 = pmov %p4149_p0 }
 0x132   : > { %3308 = dma.done.wait (%p4155_p11), [#allocation11], 256  }
 0x133   : > { %3310 = vsyncadd (%p4156_p7), [#allocation11], 4294967040 }
 0x134   : > { %537 = sfence }
 0x135   : > { %s2167_s14 = sshll.u32 %s3778_s22, 3  ;;  %p580_p13 = scmp.lt.s32.totalorder %s3479_s17, 1 }
 0x136   : > { %s4157_s25 = sld [smem:[#allocation71_spill]]  ;;  %s3799_s28 = scalar_lea.vmem [#allocation20], %s2167_s14 }
 0x137   : > { %s581_s24 = scalar_select %p580_p13, %s3479_s17, 1 }
 0x138   : > { %p4158_p12 = scmp.ne.s32.totalorder %s3479_s17, 0 }
 0x139   : > { %s2168_s27 = sshll.u32 %s581_s24, 3  ;;  %s589_s26 = sld [smem:[#allocation5]] (!%p4158_p12) }
 0x13a   : > { %588 = sbr.rel (%p4158_p12) target bundleno = 1139 (0x473), region = 108  ;;  %s3366_s18 = smov (!%p4158_p12), [#allocation2]  }
 0x13b   : > { %s599_s20 = sshll.u32 (!%p4158_p12), %s3366_s18, 4  ;;  %s3803_s2 = sld [smem:[#allocation5 + $0x1]] (!%p4158_p12)  ;;  %s3805_s20 = int_to_ptr.vmem [resolvable:$true] %s599_s20 }
 0x13c   : > { %s3797_s21 = scalar_lea.vmem %s4157_s25, %s2168_s27  ;;  %s3367_s0 = smov (!%p4158_p12), [#allocation2 + $0x1]  }
 0x13d   : > { %s615_s24 = sshll.u32 (!%p4158_p12), %s3367_s0, 4  ;;  %s3807_s3 = sld [smem:[#allocation5 + $0x2]] (!%p4158_p12)  ;;  %s3809_s24 = int_to_ptr.vmem [resolvable:$true] %s615_s24 }
 0x13e   : > { %s3368_s27 = smov (!%p4158_p12), [#allocation2 + $0x2]   ;;  %s3811_s5 = sld [smem:[#allocation5 + $0x3]] (!%p4158_p12) }
 0x13f   : > { %s631_s14 = sshll.u32 (!%p4158_p12), %s3368_s27, 4  ;;  %s2170_s11 = sshll.u32 (!%p4158_p12), %s589_s26, 4  ;;  %s3813_s14 = int_to_ptr.vmem [resolvable:$true] %s631_s14 }
 0x140   : > { %s4159_s6 = sld [smem:[#allocation61_spill]] (!%p4158_p12) }
 0x141   : > { %s2172_s8 = sshll.u32 %s3803_s2, 4 }
 0x146   : > { %s591_s7 = scalar_lea.hbm %s4159_s6, %s2170_s11  ;;  %s3822_s12 = scalar_lea.hbm %s4159_s6, 3200 }
 0x147   : > { %s3021_s9 = scalar_lea.hbm %s591_s7, 16  ;;  %p3024_p3 = scmp.lt.u32.totalorder %s591_s7, %s4159_s6 }
 0x148   : > { %p3022_p9 = scmp.ne.s32.totalorder %s591_s7, %s3021_s9  ;;  %p3025_p6 = scmp.lt.u32.totalorder %s3822_s12, %s3021_s9 }
 0x149   : > { %p3027_p0 = scmp.lt.u32.totalorder %s3021_s9, %s591_s7 }
 0x14a   : > { %p3026_p8 = por %p3025_p6, %p3024_p3 }
 0x14c   : > { %p3028_p10 = por %p3027_p0, %p3026_p8 }
 0x14e   : > { %p3029_p2 = pnand %p3028_p10, %p3022_p9 }
 0x150   : > { %3032 = shalt.err (!%p3029_p2)  }
 0x151   : > { %s3033_s26 = scalar_lea.vmem %s3805_s20, 16  ;;  %s3831_s10 = scalar_lea.vmem %s3805_s20, 128 }
 0x152   : > { %p3034_p1 = scmp.ne.s32.totalorder %s3805_s20, %s3033_s26  ;;  %p3038_p4 = scmp.lt.s32.totalorder %s3805_s20, %s3805_s20 }
 0x153   : > { %p3039_p5 = scmp.lt.s32.totalorder %s3831_s10, %s3033_s26 }
 0x155   : > { %p3040_p11 = por %p3039_p5, %p3038_p4 }
 0x157   : > { %p3041_p7 = pnand %p3040_p11, %p3034_p1 }
 0x159   : > { %3044 = shalt.err (!%p3041_p7)  }
 0x15a   : > { %602 = dma.hbm_to_vmem [thread:$0]  %s591_s7, 16, %s3805_s20, [#allocation4] }
 0x15b   : > { %s605_s23 = scalar_lea.hbm %s4159_s6, %s2172_s8  ;;  %s2174_s2 = sshll.u32 %s3807_s3, 4 }
 0x15c   : > { %s3045_s27 = scalar_lea.hbm %s605_s23, 16  ;;  %p3048_p12 = scmp.lt.u32.totalorder %s605_s23, %s4159_s6 }
 0x15d   : > { %p3046_p13 = scmp.ne.s32.totalorder %s605_s23, %s3045_s27  ;;  %p3049_p9 = scmp.lt.u32.totalorder %s3822_s12, %s3045_s27 }
 0x15e   : > { %p3051_p6 = scmp.lt.u32.totalorder %s3045_s27, %s605_s23 }
 0x15f   : > { %p3050_p3 = por %p3049_p9, %p3048_p12 }
 0x161   : > { %p3052_p8 = por %p3051_p6, %p3050_p3 }
 0x163   : > { %p3053_p0 = pnand %p3052_p8, %p3046_p13 }
 0x165   : > { %3056 = shalt.err (!%p3053_p0)  }
 0x166   : > { %s3057_s7 = scalar_lea.vmem %s3809_s24, 16  ;;  %p3062_p2 = scmp.lt.s32.totalorder %s3809_s24, %s3805_s20 }
 0x167   : > { %p3058_p10 = scmp.ne.s32.totalorder %s3809_s24, %s3057_s7  ;;  %p3063_p1 = scmp.lt.s32.totalorder %s3831_s10, %s3057_s7 }
 0x169   : > { %p3064_p4 = por %p3063_p1, %p3062_p2 }
 0x16b   : > { %p3065_p5 = pnand %p3064_p4, %p3058_p10 }
 0x16d   : > { %3068 = shalt.err (!%p3065_p5)  }
 0x16e   : > { %618 = dma.hbm_to_vmem [thread:$0]  %s605_s23, 16, %s3809_s24, [#allocation4 + $0x1] }
 0x16f   : > { %s621_s18 = scalar_lea.hbm %s4159_s6, %s2174_s2  ;;  %s2176_s0 = sshll.u32 %s3811_s5, 4 }
 0x170   : > { %s3069_s26 = scalar_lea.hbm %s621_s18, 16  ;;  %p3072_p7 = scmp.lt.u32.totalorder %s621_s18, %s4159_s6 }
 0x171   : > { %p3070_p11 = scmp.ne.s32.totalorder %s621_s18, %s3069_s26  ;;  %p3073_p13 = scmp.lt.u32.totalorder %s3822_s12, %s3069_s26 }
 0x172   : > { %p3075_p9 = scmp.lt.u32.totalorder %s3069_s26, %s621_s18 }
 0x173   : > { %p3074_p12 = por %p3073_p13, %p3072_p7 }
 0x175   : > { %p3076_p3 = por %p3075_p9, %p3074_p12 }
 0x177   : > { %p3077_p6 = pnand %p3076_p3, %p3070_p11 }
 0x179   : > { %3080 = shalt.err (!%p3077_p6)  }
 0x17a   : > { %s3081_s24 = scalar_lea.vmem %s3813_s14, 16  ;;  %p3086_p0 = scmp.lt.s32.totalorder %s3813_s14, %s3805_s20 }
 0x17b   : > { %p3082_p8 = scmp.ne.s32.totalorder %s3813_s14, %s3081_s24  ;;  %p3087_p10 = scmp.lt.s32.totalorder %s3831_s10, %s3081_s24 }
 0x17d   : > { %p3088_p2 = por %p3087_p10, %p3086_p0 }
 0x17f   : > { %p3089_p1 = pnand %p3088_p2, %p3082_p8 }
 0x181   : > { %3092 = shalt.err (!%p3089_p1)  }
 0x182   : > { %634 = dma.hbm_to_vmem [thread:$0]  %s621_s18, 16, %s3813_s14, [#allocation4 + $0x2] }
 0x183   : > { %s637_s2 = scalar_lea.hbm %s4159_s6, %s2176_s0  ;;  %s3369_s27 = smov [#allocation2 + $0x3]  }
 0x184   : > { %s647_s11 = sshll.u32 %s3369_s27, 4  ;;  %s3868_s25 = sld [smem:[#allocation5 + $0x4]]  ;;  %s648_s11 = int_to_ptr.vmem [resolvable:$true] %s647_s11 }
 0x185   : > { %s3093_s7 = scalar_lea.hbm %s637_s2, 16  ;;  %p3096_p5 = scmp.lt.u32.totalorder %s637_s2, %s4159_s6 }
 0x186   : > { %p3094_p4 = scmp.ne.s32.totalorder %s637_s2, %s3093_s7  ;;  %p3097_p11 = scmp.lt.u32.totalorder %s3822_s12, %s3093_s7 }
 0x187   : > { %p3099_p13 = scmp.lt.u32.totalorder %s3093_s7, %s637_s2 }
 0x188   : > { %p3098_p7 = por %p3097_p11, %p3096_p5 }
 0x18a   : > { %p3100_p12 = por %p3099_p13, %p3098_p7 }
 0x18c   : > { %p3101_p9 = pnand %p3100_p12, %p3094_p4 }
 0x18e   : > { %3104 = shalt.err (!%p3101_p9)  }
 0x18f   : > { %s3105_s14 = scalar_lea.vmem %s648_s11, 16  ;;  %p3110_p6 = scmp.lt.s32.totalorder %s648_s11, %s3805_s20 }
 0x190   : > { %p3106_p3 = scmp.ne.s32.totalorder %s648_s11, %s3105_s14  ;;  %p3111_p8 = scmp.lt.s32.totalorder %s3831_s10, %s3105_s14 }
 0x192   : > { %p3112_p0 = por %p3111_p8, %p3110_p6 }
 0x194   : > { %p3113_p10 = pnand %p3112_p0, %p3106_p3 }
 0x196   : > { %3116 = shalt.err (!%p3113_p10)  }
 0x197   : > { %650 = dma.hbm_to_vmem [thread:$0]  %s637_s2, 16, %s648_s11, [#allocation4 + $0x3] }
 0x198   : > { %s3370_s18 = smov [#allocation2 + $0x4]   ;;  %s3876_s26 = sld [smem:[#allocation5 + $0x5]] }
 0x199   : > { %s663_s0 = sshll.u32 %s3370_s18, 4  ;;  %s3371_s9 = smov [#allocation2 + $0x5]   ;;  %s664_s0 = int_to_ptr.vmem [resolvable:$true] %s663_s0 }
 0x19a   : > { %s679_s15 = sshll.u32 %s3371_s9, 4  ;;  %s3878_s24 = sld [smem:[#allocation5 + $0x6]]  ;;  %s3881_s15 = int_to_ptr.vmem [resolvable:$true] %s679_s15 }
 0x19b   : > { %s2178_s5 = sshll.u32 %s3868_s25, 4 }
 0x19c   : > { %s653_s7 = scalar_lea.hbm %s4159_s6, %s2178_s5 }
 0x19d   : > { %s3117_s3 = scalar_lea.hbm %s653_s7, 16  ;;  %p3120_p1 = scmp.lt.u32.totalorder %s653_s7, %s4159_s6 }
 0x19e   : > { %p3118_p2 = scmp.ne.s32.totalorder %s653_s7, %s3117_s3  ;;  %p3121_p4 = scmp.lt.u32.totalorder %s3822_s12, %s3117_s3 }
 0x19f   : > { %p3123_p11 = scmp.lt.u32.totalorder %s3117_s3, %s653_s7 }
 0x1a0   : > { %p3122_p5 = por %p3121_p4, %p3120_p1 }
 0x1a2   : > { %p3124_p7 = por %p3123_p11, %p3122_p5 }
 0x1a4   : > { %p3125_p13 = pnand %p3124_p7, %p3118_p2 }
 0x1a6   : > { %3128 = shalt.err (!%p3125_p13)  }
 0x1a7   : > { %s3129_s8 = scalar_lea.vmem %s664_s0, 16  ;;  %p3134_p9 = scmp.lt.s32.totalorder %s664_s0, %s3805_s20 }
 0x1a8   : > { %p3130_p12 = scmp.ne.s32.totalorder %s664_s0, %s3129_s8  ;;  %p3135_p3 = scmp.lt.s32.totalorder %s3831_s10, %s3129_s8 }
 0x1aa   : > { %p3136_p6 = por %p3135_p3, %p3134_p9 }
 0x1ac   : > { %p3137_p8 = pnand %p3136_p6, %p3130_p12 }
 0x1ae   : > { %3140 = shalt.err (!%p3137_p8)  }
 0x1af   : > { %666 = dma.hbm_to_vmem [thread:$0]  %s653_s7, 16, %s664_s0, [#allocation4 + $0x4] }
 0x1b0   : > { %s2180_s25 = sshll.u32 %s3876_s26, 4  ;;  %s3372_s14 = smov [#allocation2 + $0x6]  }
 0x1b1   : > { %s695_s18 = sshll.u32 %s3372_s14, 4  ;;  %s669_s23 = scalar_lea.hbm %s4159_s6, %s2180_s25  ;;  %s3896_s18 = int_to_ptr.vmem [resolvable:$true] %s695_s18 }
 0x1b2   : > { %s3141_s27 = scalar_lea.hbm %s669_s23, 16  ;;  %p3144_p10 = scmp.lt.u32.totalorder %s669_s23, %s4159_s6 }
 0x1b3   : > { %p3142_p0 = scmp.ne.s32.totalorder %s669_s23, %s3141_s27  ;;  %p3145_p2 = scmp.lt.u32.totalorder %s3822_s12, %s3141_s27 }
 0x1b4   : > { %p3147_p4 = scmp.lt.u32.totalorder %s3141_s27, %s669_s23 }
 0x1b5   : > { %p3146_p1 = por %p3145_p2, %p3144_p10 }
 0x1b7   : > { %p3148_p5 = por %p3147_p4, %p3146_p1 }
 0x1b9   : > { %p3149_p11 = pnand %p3148_p5, %p3142_p0 }
 0x1bb   : > { %3152 = shalt.err (!%p3149_p11)  }
 0x1bc   : > { %s3153_s0 = scalar_lea.vmem %s3881_s15, 16  ;;  %p3158_p13 = scmp.lt.s32.totalorder %s3881_s15, %s3805_s20 }
 0x1bd   : > { %p3154_p7 = scmp.ne.s32.totalorder %s3881_s15, %s3153_s0  ;;  %p3159_p12 = scmp.lt.s32.totalorder %s3831_s10, %s3153_s0 }
 0x1bf   : > { %p3160_p9 = por %p3159_p12, %p3158_p13 }
 0x1c1   : > { %p3161_p3 = pnand %p3160_p9, %p3154_p7 }
 0x1c3   : > { %3164 = shalt.err (!%p3161_p3)  }
 0x1c4   : > { %682 = dma.hbm_to_vmem [thread:$0]  %s669_s23, 16, %s3881_s15, [#allocation4 + $0x5] }
 0x1c5   : > { %s2182_s26 = sshll.u32 %s3878_s24, 4  ;;  %s2183_s7 = sld [smem:[#allocation5 + $0x7]] }
 0x1c6   : > { %s685_s25 = scalar_lea.hbm %s4159_s6, %s2182_s26 }
 0x1c7   : > { %s3165_s14 = scalar_lea.hbm %s685_s25, 16  ;;  %p3168_p8 = scmp.lt.u32.totalorder %s685_s25, %s4159_s6 }
 0x1c8   : > { %p3166_p6 = scmp.ne.s32.totalorder %s685_s25, %s3165_s14  ;;  %p3169_p0 = scmp.lt.u32.totalorder %s3822_s12, %s3165_s14 }
 0x1c9   : > { %p3171_p2 = scmp.lt.u32.totalorder %s3165_s14, %s685_s25 }
 0x1ca   : > { %p3170_p10 = por %p3169_p0, %p3168_p8 }
 0x1cc   : > { %p3172_p1 = por %p3171_p2, %p3170_p10 }
 0x1ce   : > { %p3173_p4 = pnand %p3172_p1, %p3166_p6 }
 0x1d0   : > { %3176 = shalt.err (!%p3173_p4)  }
 0x1d1   : > { %s3177_s15 = scalar_lea.vmem %s3896_s18, 16  ;;  %p3182_p11 = scmp.lt.s32.totalorder %s3896_s18, %s3805_s20 }
 0x1d2   : > { %p3178_p5 = scmp.ne.s32.totalorder %s3896_s18, %s3177_s15  ;;  %p3183_p7 = scmp.lt.s32.totalorder %s3831_s10, %s3177_s15 }
 0x1d4   : > { %p3184_p13 = por %p3183_p7, %p3182_p11 }
 0x1d6   : > { %p3185_p12 = pnand %p3184_p13, %p3178_p5 }
 0x1d8   : > { %3188 = shalt.err (!%p3185_p12)  }
 0x1d9   : > { %698 = dma.hbm_to_vmem [thread:$0]  %s685_s25, 16, %s3896_s18, [#allocation4 + $0x6] }
 0x1da   : > { %s3373_s24 = smov [#allocation2 + $0x7]   ;;  %s2184_s27 = sshll.u32 %s2183_s7, 4 }
 0x1db   : > { %s711_s23 = sshll.u32 %s3373_s24, 4  ;;  %s701_s0 = scalar_lea.hbm %s4159_s6, %s2184_s27  ;;  %s712_s23 = int_to_ptr.vmem [resolvable:$true] %s711_s23 }
 0x1dc   : > { %s3189_s26 = scalar_lea.hbm %s701_s0, 16  ;;  %p3192_p3 = scmp.lt.u32.totalorder %s701_s0, %s4159_s6 }
 0x1dd   : > { %p3190_p9 = scmp.ne.s32.totalorder %s701_s0, %s3189_s26  ;;  %p3193_p6 = scmp.lt.u32.totalorder %s3822_s12, %s3189_s26 }
 0x1de   : > { %p3195_p0 = scmp.lt.u32.totalorder %s3189_s26, %s701_s0 }
 0x1df   : > { %p3194_p8 = por %p3193_p6, %p3192_p3 }
 0x1e1   : > { %p3196_p10 = por %p3195_p0, %p3194_p8 }
 0x1e3   : > { %p3197_p2 = pnand %p3196_p10, %p3190_p9 }
 0x1e5   : > { %3200 = shalt.err (!%p3197_p2)  }
 0x1e6   : > { %s3201_s18 = scalar_lea.vmem %s712_s23, 16  ;;  %p3206_p4 = scmp.lt.s32.totalorder %s712_s23, %s3805_s20 }
 0x1e7   : > { %p3202_p1 = scmp.ne.s32.totalorder %s712_s23, %s3201_s18  ;;  %p3207_p5 = scmp.lt.s32.totalorder %s3831_s10, %s3201_s18 }
 0x1e9   : > { %p3208_p11 = por %p3207_p5, %p3206_p4 }
 0x1eb   : > { %p3209_p7 = pnand %p3208_p11, %p3202_p1 }
 0x1ed   : > { %3212 = shalt.err (!%p3209_p7)  }
 0x1ee   : > { %714 = dma.hbm_to_vmem [thread:$0]  %s701_s0, 16, %s712_s23, [#allocation4 + $0x7] }
 0x1ef   : > { %3311 = dma.done.wait [#allocation4], 16 }
 0x1f0   : > { %3312 = vsyncadd [#allocation4], 4294967280 }
 0x1f1   : > { %3313 = dma.done.wait [#allocation4 + $0x1], 16 }
 0x1f2   : > { %3314 = vsyncadd [#allocation4 + $0x1], 4294967280 }
 0x1f3   : > { %3315 = dma.done.wait [#allocation4 + $0x2], 16 }
 0x1f4   : > { %3316 = vsyncadd [#allocation4 + $0x2], 4294967280 }
 0x1f5   : > { %3317 = dma.done.wait [#allocation4 + $0x3], 16 }
 0x1f6   : > { %3318 = vsyncadd [#allocation4 + $0x3], 4294967280 }
 0x1f7   : > { %3319 = dma.done.wait [#allocation4 + $0x4], 16 }
 0x1f8   : > { %3320 = vsyncadd [#allocation4 + $0x4], 4294967280 }
 0x1f9   : > { %3321 = dma.done.wait [#allocation4 + $0x5], 16 }
 0x1fa   : > { %3322 = vsyncadd [#allocation4 + $0x5], 4294967280 }
 0x1fb   : > { %3323 = dma.done.wait [#allocation4 + $0x6], 16 }
 0x1fc   : > { %3324 = vsyncadd [#allocation4 + $0x6], 4294967280 }
 0x1fd   : > { %3325 = dma.done.wait [#allocation4 + $0x7], 16 }
 0x1fe   : > { %3326 = vsyncadd [#allocation4 + $0x7], 4294967280  ;;  %v3374_v0 = vmov 0.0   ;;  %v3375_v1 = vmov 0   ;;  %vm3376_vm0 = vmmov 0   ;;  %v737_v23 = vld [vmem:[#allocation2] sm:$0xff] }
 0x1ff   : > { %2353 = vmatprep.subr.bf16.mxu1 %v3374_v0  ;;  %935 = vmatprep.mubr.bf16.mxu0 %v3375_v1  ;;  %v2624_v2 = vld [vmem:[#allocation9 + $0x4] ss:$12 sps:$4 sm:$0xff]   ;;  %v2626_v3 = vld [vmem:[#allocation9] ss:$12 sps:$4 sm:$0xff]   ;;  %v2627_v4 = vld [vmem:[#allocation9 + $0x1c] ss:$12 sps:$4 sm:$0xff]   ;;  %v738_v26 = vpack.c.bf16 %v737_v23, %v737_v23 }
 0x200   : > { %2369 = vmatprep.mubr.msk.bf16.mxu1 %vm3376_vm0, %v3374_v0  ;;  %903 = vmatprep.subr.bf16.mxu0 %v2624_v2  ;;  %v2629_v5 = vld [vmem:[#allocation9 + $0x18] ss:$12 sps:$4 sm:$0xff]   ;;  %v2630_v6 = vld [vmem:[#allocation9 + $0x34] ss:$12 sps:$4 sm:$0xff]   ;;  %v2632_v7 = vld [vmem:[#allocation9 + $0x30] ss:$12 sps:$4 sm:$0xff]  }
 0x201   : > { %904 = vmatpush1.bf16.msra.mxu0 %v2626_v3  ;;  %v2633_v8 = vld [vmem:[#allocation9 + $0x4c] ss:$12 sps:$4 sm:$0xff]   ;;  %v2644_v9 = vld [vmem:[#allocation9 + $0x8] ss:$12 sps:$4 sm:$0xff]   ;;  %v2636_v11 = vld [vmem:[#allocation9 + $0x64] ss:$12 sps:$4 sm:$0xff]  }
 0x202   : > { %905 = vmatprep.subr.bf16.mxu0 %v2627_v4  ;;  %v2635_v10 = vld [vmem:[#allocation9 + $0x48] ss:$12 sps:$4 sm:$0xff]   ;;  %2354 = vmatpush3.bf16.msra.mxu1 %v2644_v9  ;;  %v2648_v12 = vld [vmem:[#allocation9 + $0x20] ss:$12 sps:$4 sm:$0xff]   ;;  %v2650_v14 = vld [vmem:[#allocation9 + $0x38] ss:$12 sps:$4 sm:$0xff]  }
 0x203   : > { %2355 = vmatprep.subr.bf16.mxu1 %v3374_v0  ;;  %v2638_v13 = vld [vmem:[#allocation9 + $0x60] ss:$12 sps:$4 sm:$0xff]   ;;  %v2639_v15 = vld [vmem:[#allocation9 + $0x7c] ss:$12 sps:$4 sm:$0xff]   ;;  %v2641_v16 = vld [vmem:[#allocation9 + $0x78] ss:$12 sps:$4 sm:$0xff]  }
 0x204   : > { %v2654_v17 = vld [vmem:[#allocation9 + $0x50] ss:$12 sps:$4 sm:$0xff]   ;;  %v2642_v18 = vld [vmem:[#allocation9 + $0x94] ss:$12 sps:$4 sm:$0xff]   ;;  %v2646_v21 = vld [vmem:[#allocation9 + $0xac] ss:$12 sps:$4 sm:$0xff]  }
 0x205   : > { %906 = vmatpush1.bf16.msra.mxu0 %v2629_v5  ;;  %v2645_v19 = vld [vmem:[#allocation9 + $0x90] ss:$12 sps:$4 sm:$0xff]   ;;  %v2658_v20 = vld [vmem:[#allocation9 + $0x68] ss:$12 sps:$4 sm:$0xff]   ;;  %v2662_v24 = vld [vmem:[#allocation9 + $0x80] ss:$12 sps:$4 sm:$0xff]  }
 0x206   : > { %907 = vmatprep.subr.bf16.mxu0 %v2630_v6  ;;  %2356 = vmatpush3.bf16.msra.mxu1 %v2648_v12  ;;  %v2649_v22 = vld [vmem:[#allocation9 + $0xa8] ss:$12 sps:$4 sm:$0xff]   ;;  %v2653_v25 = vld [vmem:[#allocation10 + $0x4] ss:$12 sps:$4 sm:$0xff]   ;;  %v2651_v27 = vld [vmem:[#allocation10] ss:$12 sps:$4 sm:$0xff]  }
 0x207   : > { %2357 = vmatprep.subr.bf16.mxu1 %v3374_v0  ;;  %v2666_v28 = vld [vmem:[#allocation9 + $0x98] ss:$12 sps:$4 sm:$0xff]   ;;  %v2657_v29 = vld [vmem:[#allocation10 + $0x1c] ss:$12 sps:$4 sm:$0xff]   ;;  %v2661_v32 = vld [vmem:[#allocation10 + $0x34] ss:$12 sps:$4 sm:$0xff]  }
 0x208   : > { %v2655_v30 = vld [vmem:[#allocation10 + $0x18] ss:$12 sps:$4 sm:$0xff]   ;;  %v2670_v31 = vld [vmem:[#allocation9 + $0xb0] ss:$12 sps:$4 sm:$0xff]   ;;  %v2677_v35 = vld [vmem:[#allocation10 + $0x8] ss:$12 sps:$4 sm:$0xff]  }
 0x209   : > { %908 = vmatpush1.bf16.msra.mxu0 %v2632_v7  ;;  %v2659_v33 = vld [vmem:[#allocation10 + $0x30] ss:$12 sps:$4 sm:$0xff]   ;;  %v2665_v34 = vld [vmem:[#allocation10 + $0x4c] ss:$12 sps:$4 sm:$0xff]   ;;  %v2663_v36 = vld [vmem:[#allocation10 + $0x48] ss:$12 sps:$4 sm:$0xff]  }
 0x20a   : > { %909 = vmatprep.subr.bf16.mxu0 %v2633_v8  ;;  %2358 = vmatpush3.bf16.msra.mxu1 %v2650_v14  ;;  %v2681_v37 = vld [vmem:[#allocation10 + $0x20] ss:$12 sps:$4 sm:$0xff]   ;;  %v2669_v38 = vld [vmem:[#allocation10 + $0x64] ss:$12 sps:$4 sm:$0xff]   ;;  %v2673_v41 = vld [vmem:[#allocation10 + $0x7c] ss:$12 sps:$4 sm:$0xff]  }
 0x20b   : > { %2359 = vmatprep.subr.bf16.mxu1 %v3374_v0  ;;  %v2667_v39 = vld [vmem:[#allocation10 + $0x60] ss:$12 sps:$4 sm:$0xff]   ;;  %v2682_v40 = vld [vmem:[#allocation10 + $0x38] ss:$12 sps:$4 sm:$0xff]   ;;  %v2683_v43 = vld [vmem:[#allocation10 + $0x50] ss:$12 sps:$4 sm:$0xff]  }
 0x20c   : > { %v2671_v42 = vld [vmem:[#allocation10 + $0x78] ss:$12 sps:$4 sm:$0xff]   ;;  %v2676_v44 = vld [vmem:[#allocation10 + $0x94] ss:$12 sps:$4 sm:$0xff]   ;;  %v2674_v45 = vld [vmem:[#allocation10 + $0x90] ss:$12 sps:$4 sm:$0xff]  }
 0x20d   : > { %910 = vmatpush1.bf16.msra.mxu0 %v2635_v10  ;;  %v2684_v46 = vld [vmem:[#allocation10 + $0x68] ss:$12 sps:$4 sm:$0xff]   ;;  %v2680_v47 = vld [vmem:[#allocation10 + $0xac] ss:$12 sps:$4 sm:$0xff]   ;;  %v2687_v53 = vld [vmem:[#allocation10 + $0xb0] ss:$12 sps:$4 sm:$0xff]  }
 0x20e   : > { %911 = vmatprep.subr.bf16.mxu0 %v2636_v11  ;;  %2360 = vmatpush3.bf16.msra.mxu1 %v2654_v17  ;;  %v2678_v48 = vld [vmem:[#allocation10 + $0xa8] ss:$12 sps:$4 sm:$0xff]   ;;  %v2685_v50 = vld [vmem:[#allocation10 + $0x80] ss:$12 sps:$4 sm:$0xff]   ;;  %v2686_v52 = vld [vmem:[#allocation10 + $0x98] ss:$12 sps:$4 sm:$0xff]  }
 0x20f   : > { %2361 = vmatprep.subr.bf16.mxu1 %v3374_v0  ;;  %v3950_v49 = vld [vmem:[#allocation19] sm:$0xff]  ;;  %v2688_v54 = vld [vmem:[#allocation12] ss:$12 sps:$4 sm:$0xff]   ;;  %v2694_v57 = vld [vmem:[#allocation12 + $0x1c] ss:$12 sps:$4 sm:$0xff]   ;;  %s4160_s10 = sld [smem:[#allocation64_spill]] }
 0x210   : > { %v984_v51 = vpack.c.bf16 %v3950_v49, %v3950_v49  ;;  %v2690_v55 = vld [vmem:[#allocation12 + $0x4] ss:$12 sps:$4 sm:$0xff]   ;;  %v2691_v56 = vld [vmem:[#allocation12 + $0x8] ss:$12 sps:$4 sm:$0xff]   ;;  %v2695_v59 = vld [vmem:[#allocation12 + $0x20] ss:$12 sps:$4 sm:$0xff]  }
 0x211   : > { %912 = vmatpush1.bf16.msra.mxu0 %v2638_v13  ;;  %v2692_v58 = vld [vmem:[#allocation12 + $0x18] ss:$12 sps:$4 sm:$0xff]   ;;  %v2698_v60 = vld [vmem:[#allocation12 + $0x34] ss:$12 sps:$4 sm:$0xff]   ;;  %v2696_v61 = vld [vmem:[#allocation12 + $0x30] ss:$12 sps:$4 sm:$0xff]  }
 0x212   : > { %913 = vmatprep.subr.bf16.mxu0 %v2639_v15  ;;  %2362 = vmatpush3.bf16.msra.mxu1 %v2658_v20  ;;  %v2699_v62 = vld [vmem:[#allocation12 + $0x38] ss:$12 sps:$4 sm:$0xff]   ;;  %v2700_v2 = vld [vmem:[#allocation12 + $0x48] ss:$12 sps:$4 sm:$0xff]   ;;  %v2703_v3 = vld [vmem:[#allocation12 + $0x50] ss:$12 sps:$4 sm:$0xff]  }
 0x213   : > { %2363 = vmatprep.subr.bf16.mxu1 %v3374_v0  ;;  %v2702_v63 = vld [vmem:[#allocation12 + $0x4c] ss:$12 sps:$4 sm:$0xff]   ;;  %v2706_v4 = vld [vmem:[#allocation12 + $0x64] ss:$12 sps:$4 sm:$0xff]   ;;  %v2707_v6 = vld [vmem:[#allocation12 + $0x68] ss:$12 sps:$4 sm:$0xff]  }
 0x214   : > { %v2704_v5 = vld [vmem:[#allocation12 + $0x60] ss:$12 sps:$4 sm:$0xff]   ;;  %v2710_v7 = vld [vmem:[#allocation12 + $0x7c] ss:$12 sps:$4 sm:$0xff]   ;;  %v2708_v8 = vld [vmem:[#allocation12 + $0x78] ss:$12 sps:$4 sm:$0xff]  }
 0x215   : > { %914 = vmatpush1.bf16.msra.mxu0 %v2641_v16  ;;  %v2711_v9 = vld [vmem:[#allocation12 + $0x80] ss:$12 sps:$4 sm:$0xff]   ;;  %v2712_v11 = vld [vmem:[#allocation12 + $0x90] ss:$12 sps:$4 sm:$0xff]   ;;  %v2715_v12 = vld [vmem:[#allocation12 + $0x98] ss:$12 sps:$4 sm:$0xff]  }
 0x216   : > { %915 = vmatprep.subr.bf16.mxu0 %v2642_v18  ;;  %2364 = vmatpush3.bf16.msra.mxu1 %v2662_v24  ;;  %v2714_v10 = vld [vmem:[#allocation12 + $0x94] ss:$12 sps:$4 sm:$0xff]   ;;  %v2718_v13 = vld [vmem:[#allocation12 + $0xac] ss:$12 sps:$4 sm:$0xff]   ;;  %v2719_v15 = vld [vmem:[#allocation12 + $0xb0] ss:$12 sps:$4 sm:$0xff]  }
 0x217   : > { %2365 = vmatprep.subr.bf16.mxu1 %v3374_v0  ;;  %v2716_v14 = vld [vmem:[#allocation12 + $0xa8] ss:$12 sps:$4 sm:$0xff]   ;;  %v2722_v16 = vld [vmem:[#allocation13 + $0x4] ss:$12 sps:$4 sm:$0xff]   ;;  %s4161_s14 = sld [smem:[#allocation65_spill]] }
 0x219   : > { %916 = vmatpush1.bf16.msra.mxu0 %v2645_v19 }
 0x21a   : > { %917 = vmatprep.subr.bf16.mxu0 %v2646_v21  ;;  %2366 = vmatpush3.bf16.msra.mxu1 %v2666_v28  ;;  %v772_v21 = vld [vmem:[%s4160_s10] sm:$0xff] }
 0x21b   : > { %2367 = vmatprep.subr.bf16.mxu1 %v3374_v0 }
 0x21d   : > { %918 = vmatpush1.bf16.msra.mxu0 %v2649_v22  ;;  %v1017_v22 = vld [vmem:[%s4161_s14] sm:$0xff]  ;;  %v1018_v28 = vld [vmem:[%s4161_s14 + $0x8] sm:$0xff] }
 0x21e   : > { %1148 = vmatprep.subr.bf16.mxu0 %v2653_v25  ;;  %2368 = vmatpush3.bf16.msra.mxu1 %v2670_v31  ;;  %v2453_v23 = vadd.f32 %v1017_v22, %v772_v21 }
 0x21f   : > { %2373 = vmatprep.subr.bf16.mxu1 %v3374_v0 }
 0x220   : > { %936 = vmatmul.mubr.bf16.vlgmr.msra.gmra.mrb[0].mxu0 %v738_v26 }
 0x221   : > { %1149 = vmatpush1.bf16.msra.mxu0 %v2651_v27  ;;  %1180 = vmatprep.mubr.bf16.mxu0 %v3375_v1  ;;  %v773_v27 = vld [vmem:[%s4160_s10 + $0x8] sm:$0xff] }
 0x222   : > { %1150 = vmatprep.subr.bf16.mxu0 %v2657_v29  ;;  %2370 = vmatmul.mubr.bf16.vlgmr.msra.gmra.mrb[0].mxu1 %v738_v26 }
 0x223   : > { %2374 = vmatpush3.bf16.msra.mxu1 %v2677_v35  ;;  %2389 = vmatprep.mubr.msk.bf16.mxu1 %vm3376_vm0, %v3374_v0 }
 0x224   : > { %2375 = vmatprep.subr.bf16.mxu1 %v3374_v0 }
 0x225   : > { %1151 = vmatpush1.bf16.msra.mxu0 %v2655_v30 }
 0x226   : > { %1152 = vmatprep.subr.bf16.mxu0 %v2661_v32  ;;  %v2455_v32 = vadd.f32 %v1018_v28, %v773_v27  ;;  %v1531_v27 = vld [vmem:[#allocation16] sm:$0xff] }
 0x227   : > { %2376 = vmatpush3.bf16.msra.mxu1 %v2681_v37 }
 0x228   : > { %2377 = vmatprep.subr.bf16.mxu1 %v3374_v0 }
 0x229   : > { %1153 = vmatpush1.bf16.msra.mxu0 %v2659_v33 }
 0x22a   : > { %1154 = vmatprep.subr.bf16.mxu0 %v2665_v34 }
 0x22b   : > { %2378 = vmatpush3.bf16.msra.mxu1 %v2682_v40 }
 0x22c   : > { %2379 = vmatprep.subr.bf16.mxu1 %v3374_v0 }
 0x22d   : > { %1155 = vmatpush1.bf16.msra.mxu0 %v2663_v36 }
 0x22e   : > { %1156 = vmatprep.subr.bf16.mxu0 %v2669_v38 }
 0x22f   : > { %2380 = vmatpush3.bf16.msra.mxu1 %v2683_v43  ;;  %v774_v43 = vld [vmem:[%s4160_s10 + $0x10] sm:$0xff] }
 0x230   : > { %2381 = vmatprep.subr.bf16.mxu1 %v3374_v0 }
 0x231   : > { %1157 = vmatpush1.bf16.msra.mxu0 %v2667_v39 }
 0x232   : > { %1158 = vmatprep.subr.bf16.mxu0 %v2673_v41  ;;  %v1019_v41 = vld [vmem:[%s4161_s14 + $0x10] sm:$0xff] }
 0x233   : > { %2382 = vmatpush3.bf16.msra.mxu1 %v2684_v46 }
 0x234   : > { %2383 = vmatprep.subr.bf16.mxu1 %v3374_v0 }
 0x235   : > { %1159 = vmatpush1.bf16.msra.mxu0 %v2671_v42 }
 0x236   : > { %1160 = vmatprep.subr.bf16.mxu0 %v2676_v44 }
 0x237   : > { %2384 = vmatpush3.bf16.msra.mxu1 %v2685_v50 }
 0x238   : > { %2385 = vmatprep.subr.bf16.mxu1 %v3374_v0 }
 0x239   : > { %1161 = vmatpush1.bf16.msra.mxu0 %v2674_v45 }
 0x23a   : > { %1162 = vmatprep.subr.bf16.mxu0 %v2680_v47 }
 0x23b   : > { %2386 = vmatpush3.bf16.msra.mxu1 %v2686_v52 }
 0x23c   : > { %2387 = vmatprep.subr.bf16.mxu1 %v3374_v0 }
 0x23d   : > { %1163 = vmatpush1.bf16.msra.mxu0 %v2678_v48 }
 0x23e   : > { %1417 = vmatprep.subr.bf16.mxu0 %v2690_v55 }
 0x23f   : > { %2388 = vmatpush3.bf16.msra.mxu1 %v2687_v53 }
 0x240   : > { %1181 = vmatmul.mubr.bf16.vlgmr.msra.gmra.mrb[0].mxu0 %v984_v51  ;;  %2393 = vmatprep.subr.bf16.mxu1 %v3374_v0 }
 0x241   : > { %1449 = vmatprep.mubr.bf16.mxu0 %v3375_v1  ;;  %1418 = vmatpush1.bf16.msra.mxu0 %v2688_v54 }
 0x242   : > { %2390 = vmatmul.mubr.bf16.vlgmr.msra.gmra.mrb[4].mxu1 %v984_v51  ;;  %1419 = vmatprep.subr.bf16.mxu0 %v2694_v57  ;;  %v732_v51 = vlaneseq }
 0x243   : > { %2409 = vmatprep.mubr.msk.bf16.mxu1 %vm3376_vm0, %v3374_v0  ;;  %2394 = vmatpush3.bf16.msra.mxu1 %v2691_v56 }
 0x244   : > { %2395 = vmatprep.subr.bf16.mxu1 %v3374_v0  ;;  %v733_v52 = vshrl.u32 %v732_v51, 7 }
 0x245   : > { %1420 = vmatpush1.bf16.msra.mxu0 %v2692_v58 }
 0x246   : > { %1421 = vmatprep.subr.bf16.mxu0 %v2698_v60  ;;  %vm734_vm1 = vcmp.lt.s32.totalorder %v733_v52, 4  ;;  %v2720_v60 = vld [vmem:[#allocation13] ss:$12 sps:$4 sm:$0xff]  }
 0x247   : > { %2396 = vmatpush3.bf16.msra.mxu1 %v2695_v59  ;;  %v3989_v57 = vsel %vm734_vm1, 1.0, %v3374_v0 }
 0x248   : > { %2397 = vmatprep.subr.bf16.mxu1 %v3374_v0 }
 0x249   : > { %1422 = vmatpush1.bf16.msra.mxu0 %v2696_v61  ;;  %v2741_v61 = vld [vmem:[#allocation13 + $0x8] ss:$12 sps:$4 sm:$0xff]  }
 0x24a   : > { %1423 = vmatprep.subr.bf16.mxu0 %v2702_v63  ;;  %v2725_v63 = vld [vmem:[#allocation13 + $0x1c] ss:$12 sps:$4 sm:$0xff]  }
 0x24b   : > { %2398 = vmatpush3.bf16.msra.mxu1 %v2699_v62 }
 0x24c   : > { %2399 = vmatprep.subr.bf16.mxu1 %v3374_v0 }
 0x24d   : > { %1424 = vmatpush1.bf16.msra.mxu0 %v2700_v2  ;;  %v2723_v2 = vld [vmem:[#allocation13 + $0x18] ss:$12 sps:$4 sm:$0xff]  }
 0x24e   : > { %1425 = vmatprep.subr.bf16.mxu0 %v2706_v4  ;;  %v2726_v4 = vld [vmem:[#allocation13 + $0x30] ss:$12 sps:$4 sm:$0xff]  }
 0x24f   : > { %2400 = vmatpush3.bf16.msra.mxu1 %v2703_v3  ;;  %v2745_v3 = vld [vmem:[#allocation13 + $0x20] ss:$12 sps:$4 sm:$0xff]  }
 0x250   : > { %2401 = vmatprep.subr.bf16.mxu1 %v3374_v0 }
 0x251   : > { %1426 = vmatpush1.bf16.msra.mxu0 %v2704_v5  ;;  %v2746_v5 = vld [vmem:[#allocation13 + $0x38] ss:$12 sps:$4 sm:$0xff]  }
 0x252   : > { %1427 = vmatprep.subr.bf16.mxu0 %v2710_v7  ;;  %v2729_v7 = vld [vmem:[#allocation13 + $0x48] ss:$12 sps:$4 sm:$0xff]  }
 0x253   : > { %2402 = vmatpush3.bf16.msra.mxu1 %v2707_v6  ;;  %v2731_v6 = vld [vmem:[#allocation13 + $0x4c] ss:$12 sps:$4 sm:$0xff]  }
 0x254   : > { %2403 = vmatprep.subr.bf16.mxu1 %v3374_v0 }
 0x255   : > { %1428 = vmatpush1.bf16.msra.mxu0 %v2708_v8  ;;  %v2747_v8 = vld [vmem:[#allocation13 + $0x50] ss:$12 sps:$4 sm:$0xff]  }
 0x256   : > { %1429 = vmatprep.subr.bf16.mxu0 %v2714_v10  ;;  %v2748_v10 = vld [vmem:[#allocation13 + $0x68] ss:$12 sps:$4 sm:$0xff]  }
 0x257   : > { %2404 = vmatpush3.bf16.msra.mxu1 %v2711_v9  ;;  %v2734_v9 = vld [vmem:[#allocation13 + $0x64] ss:$12 sps:$4 sm:$0xff]  }
 0x258   : > { %2405 = vmatprep.subr.bf16.mxu1 %v3374_v0 }
 0x259   : > { %1430 = vmatpush1.bf16.msra.mxu0 %v2712_v11  ;;  %v2737_v11 = vld [vmem:[#allocation13 + $0x7c] ss:$12 sps:$4 sm:$0xff]  }
 0x25a   : > { %1431 = vmatprep.subr.bf16.mxu0 %v2718_v13  ;;  %v2749_v13 = vld [vmem:[#allocation13 + $0x80] ss:$12 sps:$4 sm:$0xff]  }
 0x25b   : > { %2406 = vmatpush3.bf16.msra.mxu1 %v2715_v12  ;;  %v2735_v12 = vld [vmem:[#allocation13 + $0x78] ss:$12 sps:$4 sm:$0xff]  }
 0x25c   : > { %2407 = vmatprep.subr.bf16.mxu1 %v3374_v0 }
 0x25d   : > { %1432 = vmatpush1.bf16.msra.mxu0 %v2716_v14  ;;  %v2740_v14 = vld [vmem:[#allocation13 + $0x94] ss:$12 sps:$4 sm:$0xff]  }
 0x25e   : > { %1662 = vmatprep.subr.bf16.mxu0 %v2722_v16  ;;  %v2750_v16 = vld [vmem:[#allocation13 + $0x98] ss:$12 sps:$4 sm:$0xff]  }
 0x25f   : > { %2408 = vmatpush3.bf16.msra.mxu1 %v2719_v15  ;;  %v2738_v15 = vld [vmem:[#allocation13 + $0x90] ss:$12 sps:$4 sm:$0xff]  }
 0x260   : > { %2413 = vmatprep.subr.bf16.mxu1 %v3374_v0 }
 0x2f5   : > { %v978_v17 = vpop.f32.mrb[0].mxu1 }
 0x2f6   : > { %v2371_v18 = vpop.f32.mrb[1].mxu1  ;;  %v979_v46 = vadd.f32 %v978_v17, %v774_v43  ;;  %v2744_v17 = vld [vmem:[#allocation13 + $0xac] ss:$12 sps:$4 sm:$0xff]  }
 0x2f7   : > { %v981_v19 = vpop.f32.mrb[2].mxu1  ;;  %v2742_v18 = vld [vmem:[#allocation13 + $0xa8] ss:$12 sps:$4 sm:$0xff]  }
 0x2f8   : > { %v2372_v20 = vpop.f32.mrb[3].mxu1  ;;  %v1253_v19 = vld [vmem:[#allocation19 + $0x8] sm:$0xff] }
 0x2f9   : > { %v2751_v20 = vld [vmem:[#allocation13 + $0xb0] ss:$12 sps:$4 sm:$0xff]   ;;  %v1498_v21 = vpack.c.bf16 %v1253_v19, %v1253_v19 }
 0x313   : > { %v1182_v24 = vpop.f32.mrb[0].mxu0 }
 0x314   : > { %v2454_v25 = vadd.f32 %v2453_v23, %v1182_v24  ;;  %v1184_v26 = vpop.f32.mrb[1].mxu0 }
 0x315   : > { %v1186_v29 = vpop.f32.mrb[2].mxu0  ;;  %v1223_v33 = vpop.f32.mrb[4].mxu1  ;;  %v2456_v34 = vadd.f32 %v2455_v32, %v1184_v26  ;;  %v1286_v26 = vld [vmem:[#allocation15] sm:$0xff] }
 0x316   : > { %v2234_v30 = vmul.f32 -1.442695, %v2454_v25  ;;  %v1187_v31 = vpop.f32.mrb[3].mxu0  ;;  %v2391_v35 = vpop.f32.mrb[5].mxu1  ;;  %v1224_v42 = vadd.f32 %v1223_v33, %v1019_v41  ;;  %v2457_v28 = vadd.f32 %v1531_v27, %v1286_v26 }
 0x317   : > { %v1226_v36 = vpop.f32.mrb[6].mxu1  ;;  %v2235_v38 = vmul.f32 -1.442695, %v2456_v34  ;;  %v1287_v34 = vld [vmem:[#allocation15 + $0x8] sm:$0xff]  ;;  %v1532_v35 = vld [vmem:[#allocation16 + $0x8] sm:$0xff] }
 0x318   : > { %2752 = vpow2.f32 %v2234_v30  ;;  %v2392_v37 = vpop.f32.mrb[7].mxu1 }
 0x319   : > { %2754 = vpow2.f32 %v2235_v38 }
 0x322   : > { %v2753_v39 = vpop.eup %2752 }
 0x323   : > { %v1233_v40 = vadd.f32 1.0, %v2753_v39  ;;  %v2755_v44 = vpop.eup %2754 }
 0x324   : > { %v1240_v48 = vadd.f32 1.0, %v2755_v44 }
 0x325   : > { %2756 = vrcp.f32 %v1233_v40  ;;  %v2459_v40 = vadd.f32 %v1532_v35, %v1287_v34 }
 0x32f   : > { %v2757_v45 = vpop.eup %2756 }
 0x330   : > { %v1243_v47 = vmul.f32 %v2757_v45, %v1224_v42  ;;  %v1533_v45 = vld [vmem:[#allocation16 + $0x10] sm:$0xff] }
 0x332   : > { %v1244_v50 = vadd.f32 %v1243_v47, %v979_v46  ;;  %v1288_v47 = vld [vmem:[#allocation15 + $0x10] sm:$0xff] }
 0x334   : > { %2758 = vtanh.f32 %v1244_v50 }
 0x335   : > { %2760 = vrcp.f32 %v1240_v48 }
 0x33e   : > { %v2759_v53 = vpop.eup %2758 }
 0x33f   : > { %v1246_v54 = vsub.f32 %v3950_v49, %v2759_v53  ;;  %v2761_v55 = vpop.eup %2760  ;;  %v2728_v49 = vld [vmem:[#allocation13 + $0x34] ss:$12 sps:$4 sm:$0xff]  }
 0x341   : > { %v1247_v56 = vmul.f32 %v2761_v55, %v1246_v54 }
 0x343   : > { %v1248_v58 = vadd.f32 %v2759_v53, %v1247_v56 }
 0x345   : > { %v1249_v59 = vmul.f32 %v3989_v57, %v1248_v58 }
 0x347   : > { %1250 = vst [vmem:[#allocation21] sm:$0xff] %v1249_v59  ;;  %v1251_v62 = vpack.c.bf16 %v1249_v59, %v1249_v59 }
 0x349   : > { %1450 = vmatmul.mubr.bf16.vlgmr.msra.gmra.mrb[4].mxu0 %v1251_v62  ;;  %2410 = vmatmul.mubr.bf16.vlgmr.msra.gmra.mrb[8].mxu1 %v1251_v62 }
 0x34a   : > { %1663 = vmatpush1.bf16.msra.mxu0 %v2720_v60  ;;  %2414 = vmatpush3.bf16.msra.mxu1 %v2741_v61 }
 0x34b   : > { %1664 = vmatprep.subr.bf16.mxu0 %v2725_v63  ;;  %2415 = vmatprep.subr.bf16.mxu1 %v3374_v0 }
 0x34c   : > { %1694 = vmatprep.mubr.bf16.mxu0 %v3375_v1  ;;  %2429 = vmatprep.mubr.msk.bf16.mxu1 %vm3376_vm0, %v3374_v0  ;;  %v2732_v1 = vld [vmem:[#allocation13 + $0x60] ss:$12 sps:$4 sm:$0xff]  }
 0x34e   : > { %1665 = vmatpush1.bf16.msra.mxu0 %v2723_v2  ;;  %2416 = vmatpush3.bf16.msra.mxu1 %v2745_v3 }
 0x34f   : > { %1666 = vmatprep.subr.bf16.mxu0 %v2728_v49  ;;  %2417 = vmatprep.subr.bf16.mxu1 %v3374_v0 }
 0x352   : > { %1667 = vmatpush1.bf16.msra.mxu0 %v2726_v4  ;;  %2418 = vmatpush3.bf16.msra.mxu1 %v2746_v5 }
 0x353   : > { %1668 = vmatprep.subr.bf16.mxu0 %v2731_v6  ;;  %2419 = vmatprep.subr.bf16.mxu1 %v3374_v0 }
 0x356   : > { %1669 = vmatpush1.bf16.msra.mxu0 %v2729_v7  ;;  %2420 = vmatpush3.bf16.msra.mxu1 %v2747_v8 }
 0x357   : > { %1670 = vmatprep.subr.bf16.mxu0 %v2734_v9  ;;  %2421 = vmatprep.subr.bf16.mxu1 %v3374_v0 }
 0x35a   : > { %1671 = vmatpush1.bf16.msra.mxu0 %v2732_v1  ;;  %2422 = vmatpush3.bf16.msra.mxu1 %v2748_v10 }
 0x35b   : > { %1672 = vmatprep.subr.bf16.mxu0 %v2737_v11  ;;  %2423 = vmatprep.subr.bf16.mxu1 %v3374_v0 }
 0x35e   : > { %1673 = vmatpush1.bf16.msra.mxu0 %v2735_v12  ;;  %2424 = vmatpush3.bf16.msra.mxu1 %v2749_v13 }
 0x35f   : > { %1674 = vmatprep.subr.bf16.mxu0 %v2740_v14  ;;  %2425 = vmatprep.subr.bf16.mxu1 %v3374_v0 }
 0x362   : > { %1675 = vmatpush1.bf16.msra.mxu0 %v2738_v15  ;;  %2426 = vmatpush3.bf16.msra.mxu1 %v2750_v16 }
 0x363   : > { %1676 = vmatprep.subr.bf16.mxu0 %v2744_v17  ;;  %2427 = vmatprep.subr.bf16.mxu1 %v3374_v0 }
 0x366   : > { %1677 = vmatpush1.bf16.msra.mxu0 %v2742_v18  ;;  %2428 = vmatpush3.bf16.msra.mxu1 %v2751_v20 }
 0x369   : > { %1695 = vmatmul.mubr.bf16.vlgmr.msra.gmra.mrb[4].mxu0 %v1498_v21  ;;  %2430 = vmatmul.mubr.bf16.vlgmr.msra.gmra.mrb[12].mxu1 %v1498_v21 }
 0x41c   : > { %v1492_v22 = vpop.f32.mrb[8].mxu1 }
 0x41d   : > { %v2411_v23 = vpop.f32.mrb[9].mxu1  ;;  %v1493_v51 = vadd.f32 %v1492_v22, %v1288_v47 }
 0x41e   : > { %v1495_v24 = vpop.f32.mrb[10].mxu1 }
 0x41f   : > { %v2412_v25 = vpop.f32.mrb[11].mxu1 }
 0x43c   : > { %v1696_v29 = vpop.f32.mrb[4].mxu0  ;;  %v1737_v30 = vpop.f32.mrb[12].mxu1 }
 0x43d   : > { %v2458_v31 = vadd.f32 %v2457_v28, %v1696_v29  ;;  %v1698_v32 = vpop.f32.mrb[5].mxu0  ;;  %v2431_v33 = vpop.f32.mrb[13].mxu1  ;;  %v1738_v46 = vadd.f32 %v1737_v30, %v1533_v45 }
 0x43e   : > { %v1700_v0 = vpop.f32.mrb[6].mxu0  ;;  %v1740_v36 = vpop.f32.mrb[14].mxu1  ;;  %v2460_v41 = vadd.f32 %v2459_v40, %v1698_v32 }
 0x43f   : > { %v2284_v37 = vmul.f32 -1.442695, %v2458_v31  ;;  %v1701_v38 = vpop.f32.mrb[7].mxu0  ;;  %v2432_v39 = vpop.f32.mrb[15].mxu1 }
 0x440   : > { %v2285_v42 = vmul.f32 -1.442695, %v2460_v41 }
 0x441   : > { %2762 = vpow2.f32 %v2284_v37 }
 0x442   : > { %2764 = vpow2.f32 %v2285_v42 }
 0x44b   : > { %v2763_v43 = vpop.eup %2762 }
 0x44c   : > { %v1747_v44 = vadd.f32 1.0, %v2763_v43  ;;  %v2765_v48 = vpop.eup %2764 }
 0x44d   : > { %v1754_v53 = vadd.f32 1.0, %v2765_v48 }
 0x44e   : > { %2766 = vrcp.f32 %v1747_v44 }
 0x458   : > { %v2767_v50 = vpop.eup %2766 }
 0x459   : > { %v1757_v52 = vmul.f32 %v2767_v50, %v1738_v46 }
 0x45b   : > { %v1758_v54 = vadd.f32 %v1757_v52, %v1493_v51 }
 0x45d   : > { %2768 = vtanh.f32 %v1758_v54 }
 0x45e   : > { %2770 = vrcp.f32 %v1754_v53 }
 0x467   : > { %v2769_v55 = vpop.eup %2768 }
 0x468   : > { %v1760_v56 = vsub.f32 %v1253_v19, %v2769_v55  ;;  %v2771_v58 = vpop.eup %2770 }
 0x46a   : > { %v1761_v59 = vmul.f32 %v2771_v58, %v1760_v56 }
 0x46c   : > { %v1762_v60 = vadd.f32 %v2769_v55, %v1761_v59 }
 0x46e   : > { %v1763_v61 = vmul.f32 %v3989_v57, %v1762_v60 }
 0x470   : > { %1765 = vst [vmem:[#allocation21 + $0x8] sm:$0xff] %v1763_v61  ;;  %v1766_v62 = vpack.c.bf16 %v1763_v61, %v1763_v61 }
 0x472   : > { %1767 = vst [vmem:[#allocation3] sm:$0xf] %v1766_v62 }
 0x473 PF: > { %v2772_v63 = vld [vmem:[%s3781_s4] sm:$0xff]   ;;  %v3377_v2 = vmov 0.0   ;;  %v2773_v3 = vld [vmem:[%s3781_s4 + $0x8] sm:$0xff]   ;;  %vm3378_vm2 = vmmov 0   ;;  %v2774_v57 = vld [vmem:[%s3781_s4 + $0x10] sm:$0xff]   ;;  %s3379_s0 = smov [#allocation21]  }
 0x474   : > { %2433 = vmatprep.subr.bf16.mxu0 %v3377_v2  ;;  %2449 = vmatprep.mubr.msk.bf16.mxu0 %vm3378_vm2, %v3377_v2  ;;  %v2775_v49 = vld [vmem:[%s3781_s4 + $0x18] sm:$0xff]   ;;  %v2776_v4 = vld [vmem:[%s3781_s4 + $0x20] sm:$0xff]   ;;  %v2777_v5 = vld [vmem:[%s3781_s4 + $0x28] sm:$0xff]   ;;  %s1899_s26 = sshll.u32 %s3379_s0, 4  ;;  %p4162_p12 = scmp.eq.s32.totalorder %s3479_s17, 1  ;;  %s1900_s26 = int_to_ptr.vmem [resolvable:$true] %s1899_s26 }
 0x475   : > { %2434 = vmatpush3.bf16.msra.mxu0 %v2772_v63  ;;  %v2778_v6 = vld [vmem:[%s3781_s4 + $0x30] sm:$0xff]   ;;  %v2779_v7 = vld [vmem:[%s3781_s4 + $0x38] sm:$0xff]   ;;  %s3213_s11 = scalar_lea.vmem %s1900_s26, 256  ;;  %p3220_p6 = scmp.lt.s32.totalorder %s1900_s26, %s1900_s26 }
 0x476   : > { %2435 = vmatprep.subr.bf16.mxu0 %v3377_v2  ;;  %p3214_p13 = scmp.ne.s32.totalorder %s1900_s26, %s3213_s11  ;;  %p3221_p8 = scmp.lt.s32.totalorder %s3213_s11, %s3213_s11 }
 0x478   : > { %p3215_p9 = pnand %p3214_p13, %p4162_p12  ;;  %p3222_p0 = por %p3221_p8, %p3220_p6 }
 0x479   : > { %2436 = vmatpush3.bf16.msra.mxu0 %v2773_v3  ;;  %v1768_v8 = vld [vmem:[#allocation3] sm:$0xf] }
 0x47a   : > { %2437 = vmatprep.subr.bf16.mxu0 %v3377_v2  ;;  %p3216_p3 = pneg %p3215_p9 }
 0x47c   : > { %p3223_p10 = pnand %p3222_p0, %p3216_p3 }
 0x47d   : > { %2438 = vmatpush3.bf16.msra.mxu0 %v2774_v57 }
 0x47e   : > { %2439 = vmatprep.subr.bf16.mxu0 %v3377_v2 }
 0x481   : > { %2440 = vmatpush3.bf16.msra.mxu0 %v2775_v49 }
 0x482   : > { %2441 = vmatprep.subr.bf16.mxu0 %v3377_v2 }
 0x485   : > { %2442 = vmatpush3.bf16.msra.mxu0 %v2776_v4 }
 0x486   : > { %2443 = vmatprep.subr.bf16.mxu0 %v3377_v2 }
 0x489   : > { %2444 = vmatpush3.bf16.msra.mxu0 %v2777_v5 }
 0x48a   : > { %2445 = vmatprep.subr.bf16.mxu0 %v3377_v2 }
 0x48d   : > { %2446 = vmatpush3.bf16.msra.mxu0 %v2778_v6 }
 0x48e   : > { %2447 = vmatprep.subr.bf16.mxu0 %v3377_v2 }
 0x491   : > { %2448 = vmatpush3.bf16.msra.mxu0 %v2779_v7 }
 0x494   : > { %2450 = vmatmul.mubr.bf16.vlgmr.msra.gmra.mrb[0].mxu0 %v1768_v8 }
 0x495   : > { %3226 = shalt.err (!%p3223_p10)
}
 0x496   : > { %s4163_s4 = sld [smem:[#allocation74_spill]]  ;;  %p4164_p1 = pmov %p4162_p12 }
 0x49c   : > { %s3227_s12 = scalar_lea.hbm %s4163_s4, 256 }
 0x49d   : > { %p3228_p2 = scmp.ne.s32.totalorder %s4163_s4, %s3227_s12  ;;  %p3233_p11 = scmp.lt.u32.totalorder %s3227_s12, %s4163_s4 }
 0x49f   : > { %p3229_p4 = pnand %p3228_p2, %p4164_p1 }
 0x4a1   : > { %p3230_p5 = pneg %p3229_p4 }
 0x4a3   : > { %p3235_p7 = pnand %p3233_p11, %p3230_p5 }
 0x4a5   : > { %3238 = shalt.err (!%p3235_p7)
}
 0x4a6   : > { %s3380_s5 = smov 128   ;;  %s3381_s15 = smov 8   ;;  %v1785_v9 = vld [vmem:[%s3797_s21] sm:$0xff] }
 0x4a7   : > { %p4165_p13 = pmov %p4164_p1  ;;  %s2295_s27 = sshll.u32 %s3479_s17, 7 }
 0x4a8   : > { %s1889_s3 = sshll.u32 %s3799_s28, 4  ;;  %s4166_s11 = sld [smem:[#allocation73_spill]]  ;;  %s4037_s3 = int_to_ptr.vmem [resolvable:$true] %s1889_s3 }
 0x4a9   : > { %2505 = dma.vmem_to_hbm [thread:$0]  (%p4165_p13), %s1900_s26, 256, %s4163_s4, [#allocation22], %s3380_s5, %s3380_s5, %s3381_s15  }
 0x4aa   : > { %s1876_s26 = scalar_lea.sflag [#allocation7], %s3778_s22  ;;  %s3239_s21 = scalar_lea.vmem %s4037_s3, 128 }
 0x4ab   : > { %p3240_p12 = scmp.ne.s32.totalorder %s4037_s3, %s3239_s21  ;;  %p4167_p9 = scmp.ne.s32.totalorder %s4140_s19, 0 }
 0x4ac   : > { %s3382_s18 = smov [#allocation20]  }
 0x4ad   : > { %p3241_p3 = pnand %p3240_p12, %p4167_p9  ;;  %s3243_s12 = sshll.u32 %s3382_s18, 4  ;;  %s3244_s12 = int_to_ptr.vmem [resolvable:$false] %s3243_s12 }
 0x4ae   : > { %s4035_s8 = scalar_lea.hbm %s4166_s11, %s2295_s27  ;;  %s3245_s20 = scalar_lea.vmem %s3244_s12, 256 }
 0x4af   : > { %p3242_p6 = pneg %p3241_p3  ;;  %p3246_p8 = scmp.lt.s32.totalorder %s4037_s3, %s3244_s12 }
 0x4b0   : > { %p3247_p0 = scmp.lt.s32.totalorder %s3245_s20, %s3239_s21 }
 0x4b2   : > { %p3248_p10 = por %p3247_p0, %p3246_p8 }
 0x4b4   : > { %p3249_p2 = pnand %p3248_p10, %p3242_p6 }
 0x567   : > { %v1868_v1 = vpop.f32.mrb[0].mxu0 }
 0x568   : > { %v1869_v10 = vadd.f32 %v1868_v1, %v1785_v9  ;;  %v2451_v11 = vpop.f32.mrb[1].mxu0 }
 0x569   : > { %v1871_v12 = vpop.f32.mrb[2].mxu0 }
 0x56a   : > { %1874 = vst [vmem:[%s3799_s28] sm:$0xff] %v1869_v10  ;;  %v2452_v13 = vpop.f32.mrb[3].mxu0 }
 0x56b   : > { %3252 = shalt.err (!%p3249_p2)
}
 0x56c   : > { %s3253_s22 = scalar_lea.hbm %s4035_s8, 128  ;;  %s3257_s25 = scalar_lea.hbm %s4166_s11, 256 }
 0x56d   : > { %p3254_p1 = scmp.ne.s32.totalorder %s4035_s8, %s3253_s22  ;;  %p3258_p11 = scmp.lt.u32.totalorder %s4035_s8, %s4166_s11 }
 0x56e   : > { %p3259_p7 = scmp.lt.u32.totalorder %s3257_s25, %s3253_s22  ;;  %p3261_p12 = scmp.lt.u32.totalorder %s3253_s22, %s4035_s8 }
 0x56f   : > { %p3255_p4 = pnand %p3254_p1, %p4167_p9 }
 0x570   : > { %p3260_p13 = por %p3259_p7, %p3258_p11 }
 0x571   : > { %p3256_p5 = pneg %p3255_p4 }
 0x572   : > { %p3262_p3 = por %p3261_p12, %p3260_p13 }
 0x574   : > { %p3263_p6 = pnand %p3262_p3, %p3256_p5 }
 0x576   : > { %3266 = shalt.err (!%p3263_p6)
}
 0x577   : > { %2503 = dma.vmem_to_hbm [thread:$0]  (%p4167_p9), %s4037_s3, 128, %s4035_s8, %s1876_s26  }
 0x578   : > { %p4168_p8 = scmp.eq.s32.totalorder %s3479_s17, 1 }
 0x57a   : > { %3328 = dma.done.wait (%p4168_p8), [#allocation22], 256   ;;  %p4169_p0 = pmov %p4168_p8 }
 0x57c   : > { %3330 = vsyncadd (%p4169_p0), [#allocation22], 4294967040 }
 0x57d PF: > { %s1918_s15 = sand.u32 1, %s3337_s29   ;;  %p4170_p10 = scmp.ne.s32.totalorder %s4141_s13, 0 }
 0x57e   : > { %p4171_p2 = scmp.ge.s32.totalorder %s3349_s16, 2  ;;  %s1919_s24 = scalar_lea.sflag [#allocation7], %s1918_s15 }
 0x580   : > { %p2539_p1 = pnand %p4171_p2, %p4170_p10 }
 0x582   : > { %3332 = dma.done.wait (!%p2539_p1), %s1919_s24, 128  }
 0x583   : > { %3334 = vsyncadd (!%p2539_p1), %s1919_s24, 4294967168  ;;  %s4172_s19 = sld [smem:[#allocation58_spill]]  ;;  %s4173_s15 = sld [smem:[#allocation59_spill]] }
 0x584   : > { %p31_p9 = scmp.ge.s32.totalorder %s3674_s1, 4   ;;  %s4174_s29 = smov %s3341_s30 }
 0x585   : > { %s4176_s16 = smov %s3674_s1 }
 0x586   :  { %33 = sbr.rel (!%p31_p9) target bundleno = 25 (0x19), region = 223 }
 0x589   : > { %s4175_s30 = smov %s4172_s19 }
 0x58d   :  { %1924 = vsyncpa [#allocation6], 1 }
 0x58e   :  { %1926 = vsyncpa [#allocation6 + $0x1], 1 }
 0x58f   :  { %1927 = vsyncpa [#allocation11], 1 }
 0x590   :  { %1928 = vsyncpa [#allocation14], 1 }
 0x591   :  { %1929 = vsyncpa [#allocation17], 1 }
 0x592   :  { %1930 = vsyncpa [#allocation7], 1 }
 0x593   :  { %1932 = vsyncpa [#allocation7 + $0x1], 1 }
 0x594   :  { %1933 = vsyncpa [#allocation22], 1 }
 0x595   :  { %1934 = vsyncpa [#allocation8], 1 }
 0x596   :  { %1936 = vsyncpa [#allocation8 + $0x1], 1 }
 0x597   :  { %1937 = vsyncmov [#allocation4] }
 0x59a   :  { %s1938_s16 = vpop.sfrf %1937 }
 0x59b   :  { %p2300_p4 = scmp.ne.s32.totalorder %s1938_s16, 0 }
 0x59d   :  { %1942 = shalt.err (%p2300_p4)  }
 0x59e   :  { %1944 = vsyncmov [#allocation4 + $0x1] }
 0x5a1   :  { %s1945_s17 = vpop.sfrf %1944 }
 0x5a2   :  { %p2301_p5 = scmp.ne.s32.totalorder %s1945_s17, 0 }
 0x5a4   :  { %1949 = shalt.err (%p2301_p5)  }
 0x5a5   :  { %1951 = vsyncmov [#allocation4 + $0x2] }
 0x5a8   :  { %s1952_s1 = vpop.sfrf %1951 }
 0x5a9   :  { %p2302_p11 = scmp.ne.s32.totalorder %s1952_s1, 0 }
 0x5ab   :  { %1956 = shalt.err (%p2302_p11)  }
 0x5ac   :  { %1958 = vsyncmov [#allocation4 + $0x3] }
 0x5af   :  { %s1959_s6 = vpop.sfrf %1958 }
 0x5b0   :  { %p2303_p7 = scmp.ne.s32.totalorder %s1959_s6, 0 }
 0x5b2   :  { %1963 = shalt.err (%p2303_p7)  }
 0x5b3   :  { %1965 = vsyncmov [#allocation4 + $0x4] }
 0x5b6   :  { %s1966_s29 = vpop.sfrf %1965 }
 0x5b7   :  { %p2304_p13 = scmp.ne.s32.totalorder %s1966_s29, 0 }
 0x5b9   :  { %1970 = shalt.err (%p2304_p13)  }
 0x5ba   :  { %1972 = vsyncmov [#allocation4 + $0x5] }
 0x5bd   :  { %s1973_s30 = vpop.sfrf %1972 }
 0x5be   :  { %p2305_p12 = scmp.ne.s32.totalorder %s1973_s30, 0 }
 0x5c0   :  { %1977 = shalt.err (%p2305_p12)  }
 0x5c1   :  { %1979 = vsyncmov [#allocation4 + $0x6] }
 0x5c4   :  { %s1980_s13 = vpop.sfrf %1979 }
 0x5c5   :  { %p2306_p3 = scmp.ne.s32.totalorder %s1980_s13, 0 }
 0x5c7   :  { %1984 = shalt.err (%p2306_p3)  }
 0x5c8   :  { %1986 = vsyncmov [#allocation4 + $0x7] }
 0x5cb   :  { %s1987_s10 = vpop.sfrf %1986 }
 0x5cc   :  { %p2307_p6 = scmp.ne.s32.totalorder %s1987_s10, 0 }
 0x5ce   :  { %1991 = shalt.err (%p2307_p6)  }

</bundles_post_ra>
